<compile_context>
chip_gen: v5e
topology: v5e:2x2
jax: 0.10.0
libtpu: 0.0.40
codegen_flags: <defaults>
</compile_context>

<pallas_src>
import jax
import jax.numpy as jnp
from jax.experimental import pallas as pl
from jax.experimental.pallas import tpu as pltpu

_NEG_INF = -1e30
_LEAKY_SLOPE = 0.2


def _gat_prelu_kernel(nz_ref,                       # scalar-prefetch (SMEM)
                      a_dst_ref, a_src_ref, h_ref, bias_ref, prelu_ref, adj_ref,
                      o_ref,
                      m_scr, l_scr, acc_scr):
    i = pl.program_id(0)
    j = pl.program_id(1)
    nj = pl.num_programs(1)

    # ---- init (once per row tile): online-softmax state ----
    @pl.when(j == 0)
    def _init():
        m_scr[...] = jnp.full_like(m_scr, _NEG_INF)
        l_scr[...] = jnp.zeros_like(l_scr)
        acc_scr[...] = jnp.zeros_like(acc_scr)

    # ---- per neighbor tile: only if this adjacency tile has any edge ----
    @pl.when(nz_ref[i * nj + j] != 0)
    def _step():
        # attention logits: a_dst[i] + a_src[j], LeakyReLU(0.2), adjacency mask
        s = a_dst_ref[...] + a_src_ref[...]                    # [tm,1]+[1,tk] -> [tm,tk]
        s = jnp.maximum(s, _LEAKY_SLOPE * s)                   # LeakyReLU, 2 VPU ops
        s = jnp.where(adj_ref[...] != 0, s, _NEG_INF)          # int8 compare, no cast

        m_prev = m_scr[...]
        m_new = jnp.maximum(m_prev, jnp.max(s, axis=-1, keepdims=True))   # [tm,1]
        corr = jnp.exp(m_prev - m_new)
        # Masked entries underflow: exp(-1e30 - m_new) == 0 once m_new is finite.
        # Rows that have not yet seen a real edge (m_new == -1e30) accumulate
        # finite garbage that is wiped by corr == 0 at their first real edge,
        # which always exists because self-loops are injected (incl. padding).
        p = jnp.exp(s - m_new)                                             # [tm,tk]

        l_scr[...] = corr * l_scr[...] + jnp.sum(p, axis=-1, keepdims=True)
        acc_scr[...] = corr * acc_scr[...] + jnp.dot(
            p.astype(jnp.bfloat16), h_ref[...],
            preferred_element_type=jnp.float32)                            # [tm,Cp]
        m_scr[...] = m_new

    # ---- finalize (once per row tile): normalize, bias, PReLU, store ----
    @pl.when(j == nj - 1)
    def _finalize():
        # guard against a (caller-error) all-isolated row: l == 0
        inv_l = pl.reciprocal(jnp.maximum(l_scr[...], 1e-20), approx=True)  # EUP
        out = acc_scr[...] * inv_l + bias_ref[...]
        out = jnp.where(out >= 0.0, out, prelu_ref[...] * out)              # PReLU
        o_ref[...] = out.astype(o_ref.dtype)


def _round_up(n, m):
    return ((n + m - 1) // m) * m


def _pick_tile(n, candidates, cap=None):
    for c in candidates:
        if (cap is None or c <= cap) and c <= n and n % c == 0:
            return c
    return 128


def encoder_forward(x, w, att_src, att_dst, bias, prelu_w, adj, *,
                    tm=None, tk=None):
    """GATConv(heads=1, concat=True) + PReLU.

    x:        [N, Fin]  node features
    w:        [Fin, C]  GATConv linear weight (C = hidden * heads)
    att_src:  [1, C]    attention vector (source term)
    att_dst:  [1, C]    attention vector (destination term)
    bias:     [1, C]    GATConv bias
    prelu_w:  [1, C]    PReLU per-channel slope
    adj:      [N, N]    dense mask, adj[i, j] != 0 iff edge j -> i (self-loops included)
    """
    n, fin = x.shape
    c = w.shape[1]
    np_ = _round_up(n, 128)          # node padding: 128-aligned adjacency tiles
    cp = _round_up(c, 128)           # channel padding: lane-dense output stores

    # ---- hoisted precompute (XLA): H = X @ W, per-node attention logits ----
    h_f32 = jnp.dot(x.astype(jnp.float32), w.astype(jnp.float32),
                    preferred_element_type=jnp.float32)                    # [N, C]
    a_src = jnp.dot(h_f32, att_src.reshape(c, 1))                           # [N, 1]
    a_dst = jnp.dot(h_f32, att_dst.reshape(c, 1))                           # [N, 1]

    h_p = jnp.zeros((np_, cp), jnp.bfloat16).at[:n, :c].set(
        h_f32.astype(jnp.bfloat16))
    a_src_p = jnp.zeros((1, np_), jnp.float32).at[0, :n].set(a_src[:, 0])
    a_dst_p = jnp.zeros((np_, 1), jnp.float32).at[:n, 0].set(a_dst[:, 0])
    b_p = jnp.zeros((1, cp), jnp.float32).at[:, :c].set(bias.reshape(1, c))
    pw_p = jnp.zeros((1, cp), jnp.float32).at[:, :c].set(prelu_w.reshape(1, c))

    adj_p = jnp.zeros((np_, np_), jnp.int8).at[:n, :n].set(
        (adj != 0).astype(jnp.int8))
    # give padded nodes a self-loop so their (discarded) rows stay well defined
    pad_ids = jnp.arange(n, np_)
    adj_p = adj_p.at[pad_ids, pad_ids].set(jnp.int8(1))

    # ---- tile selection ----
    if tm is None:
        # keep >= 2 row tiles whenever possible so both v7x TensorCores get work
        tm = _pick_tile(np_, (256, 128), cap=max(128, np_ // 2))
    if tk is None:
        tk = _pick_tile(np_, (1024, 512, 256, 128))
    grid = (np_ // tm, np_ // tk)
    ni, nj = grid

    # per-tile nonzero flags for block-sparse skipping (scalar prefetch, SMEM)
    nz = (adj_p.reshape(ni, tm, nj, tk) != 0).any(axis=(1, 3))
    nz = nz.reshape(ni * nj).astype(jnp.int32)

    # ---- VMEM budget from tile math (double-buffered inputs + temporaries) ----
    vmem_est = (
        2 * tk * cp * 2                 # H tile (bf16), double-buffered
        + 2 * tm * tk                   # adj tile (int8), double-buffered
        + 2 * (tk + tm + 2 * cp) * 4    # a_src / a_dst / bias / prelu
        + 2 * tm * cp * 4               # output tile, double-buffered
        + (tm * cp + 2 * tm) * 4        # scratch: acc + m + l
        + 6 * tm * tk * 4               # s / p / exp temporaries headroom
    )
    vmem_limit = int(min(max(2 * vmem_est, 32 << 20), 64 << 20))

    out_p = pl.pallas_call(
        _gat_prelu_kernel,
        out_shape=jax.ShapeDtypeStruct((np_, cp), jnp.float32),
        grid_spec=pltpu.PrefetchScalarGridSpec(
            num_scalar_prefetch=1,
            grid=grid,
            in_specs=[
                pl.BlockSpec((tm, 1), lambda i, j, nz: (i, 0)),    # a_dst column
                pl.BlockSpec((1, tk), lambda i, j, nz: (0, j)),    # a_src row
                pl.BlockSpec((tk, cp), lambda i, j, nz: (j, 0)),   # H (bf16)
                pl.BlockSpec((1, cp), lambda i, j, nz: (0, 0)),    # bias
                pl.BlockSpec((1, cp), lambda i, j, nz: (0, 0)),    # PReLU slope
                pl.BlockSpec((tm, tk), lambda i, j, nz: (i, j)),   # adjacency (int8)
            ],
            out_specs=pl.BlockSpec((tm, cp), lambda i, j, nz: (i, 0)),
            scratch_shapes=[
                pltpu.VMEM((tm, 1), jnp.float32),    # running max m
                pltpu.VMEM((tm, 1), jnp.float32),    # running denom l
                pltpu.VMEM((tm, cp), jnp.float32),   # output accumulator
            ]),
        compiler_params=pltpu.CompilerParams(
            dimension_semantics=("parallel", "arbitrary"),
            vmem_limit_bytes=vmem_limit),
    )(nz, a_dst_p, a_src_p, h_p, b_p, pw_p, adj_p)

    return out_p[:n, :c]


def build_dense_adj(edge_index, num_nodes):
    """adj[i, j] = 1 iff edge j -> i (source j, target i), plus self-loops (int8)."""
    src, dst = edge_index
    adj = jnp.zeros((num_nodes, num_nodes), jnp.int8)
    adj = adj.at[dst, src].set(jnp.int8(1))
    diag = jnp.arange(num_nodes)
    adj = adj.at[diag, diag].set(jnp.int8(1))        # add_self_loops=True
    return adj


def encoder_reference(x, w, att_src, att_dst, bias, prelu_w, adj):
    """Pure-JAX dense reference: GATConv(heads=1) + PReLU."""
    h = x @ w
    a_src = jnp.sum(h * att_src, axis=-1)
    a_dst = jnp.sum(h * att_dst, axis=-1)
    s = a_dst[:, None] + a_src[None, :]
    s = jnp.where(s >= 0.0, s, 0.2 * s)
    s = jnp.where(adj != 0, s, -jnp.inf)
    alpha = jax.nn.softmax(s, axis=-1)
    out = alpha @ h + bias
    return jnp.where(out >= 0.0, out, prelu_w * out)


if __name__ == "__main__":
    # Small deterministic setup: N=8 nodes, in_channels=16, hidden_channels=32, heads=1
    N, Fin, hidden, heads = 8, 16, 32, 1
    C = hidden * heads

    key = jax.random.PRNGKey(0)
    kx, kw, ks, kd, kx2 = jax.random.split(key, 5)

    x = jax.random.normal(kx, (N, Fin), jnp.float32)
    w = jax.random.normal(kw, (Fin, C), jnp.float32) * (1.0 / jnp.sqrt(Fin))
    att_src = jax.random.normal(ks, (1, C), jnp.float32) * 0.1
    att_dst = jax.random.normal(kd, (1, C), jnp.float32) * 0.1
    bias = jnp.zeros((1, C), jnp.float32)
    prelu_w = jnp.full((1, C), 0.25, jnp.float32)

    # directed ring graph: edges i -> (i+1) % N
    src = jnp.arange(N, dtype=jnp.int32)
    dst = (src + 1) % N
    edge_index = jnp.stack([src, dst], axis=0)
    adj = build_dense_adj(edge_index, N)

    out = encoder_forward(x, w, att_src, att_dst, bias, prelu_w, adj)
    out = jax.block_until_ready(out)
    assert out.shape == (N, C) and out.dtype == jnp.float32
    ref = encoder_reference(x, w, att_src, att_dst, bias, prelu_w, adj)
    assert jnp.allclose(out, ref, atol=5e-2, rtol=5e-2), float(
        jnp.max(jnp.abs(out - ref)))

    # second case: N=200 -> padded to 256, multiple row tiles (tm=128), all
    # adjacency tiles nonzero -> exercises cross-tile online softmax.
    N2 = 200
    x2 = jax.random.normal(kx2, (N2, Fin), jnp.float32)
    src2 = jnp.arange(N2, dtype=jnp.int32)
    dst2 = (src2 + 1) % N2
    adj2 = build_dense_adj(jnp.stack([src2, dst2], axis=0), N2)
    out2 = encoder_forward(x2, w, att_src, att_dst, bias, prelu_w, adj2,
                           tm=128, tk=128)
    out2 = jax.block_until_ready(out2)
    ref2 = encoder_reference(x2, w, att_src, att_dst, bias, prelu_w, adj2)
    assert out2.shape == (N2, C)
    assert jnp.allclose(out2, ref2, atol=5e-2, rtol=5e-2), float(
        jnp.max(jnp.abs(out2 - ref2)))

    # third case: block-sparse graph -> off-diagonal 128x128 adjacency tiles are
    # empty, exercising the scalar-prefetch tile-skipping path.
    N3 = 200
    src3 = jnp.arange(99, dtype=jnp.int32)            # edges only among nodes 0..99
    dst3 = src3 + 1
    adj3 = build_dense_adj(jnp.stack([src3, dst3], axis=0), N3)
    x3 = jax.random.normal(kx2, (N3, Fin), jnp.float32)
    out3 = encoder_forward(x3, w, att_src, att_dst, bias, prelu_w, adj3,
                           tm=128, tk=128)
    out3 = jax.block_until_ready(out3)
    ref3 = encoder_reference(x3, w, att_src, att_dst, bias, prelu_w, adj3)
    assert out3.shape == (N3, C)
    assert jnp.allclose(out3, ref3, atol=5e-2, rtol=5e-2), float(
        jnp.max(jnp.abs(out3 - ref3)))

    print("KERNEL_OK")
</pallas_src>

<mosaic_0001>
module attributes {stable_mosaic.version = 11 : i64} {
  func.func @_gat_prelu_kernel(%arg0: i32, %arg1: i32, %arg2: memref<1xi32, #tpu.memory_space<smem>>, %arg3: memref<128x1xf32, #tpu.memory_space<vmem>>, %arg4: memref<1x128xf32, #tpu.memory_space<vmem>>, %arg5: memref<128x128xbf16, #tpu.memory_space<vmem>>, %arg6: memref<1x128xf32, #tpu.memory_space<vmem>>, %arg7: memref<1x128xf32, #tpu.memory_space<vmem>>, %arg8: memref<128x128xi8, #tpu.memory_space<vmem>>, %arg9: memref<128x128xf32, #tpu.memory_space<vmem>>, %arg10: memref<128x1xf32, #tpu.memory_space<vmem>>, %arg11: memref<128x1xf32, #tpu.memory_space<vmem>>, %arg12: memref<128x128xf32, #tpu.memory_space<vmem>>) attributes {dimension_semantics = [#tpu.dimension_semantics<parallel>, #tpu.dimension_semantics<arbitrary>], iteration_bounds = array<i64: 1, 1>, scalar_prefetch = 1 : i64, scratch_operands = 3 : i64, tpu.core_type = #tpu.core_type<tc>, window_params = [{transform_indices = @transform_0, window_bounds = array<i64: 128, 1>}, {transform_indices = @transform_1, window_bounds = array<i64: 1, 128>}, {transform_indices = @transform_2, window_bounds = array<i64: 128, 128>}, {pipeline_mode = #tpu.pipeline_mode<synchronous>, transform_indices = @transform_3, window_bounds = array<i64: 1, 128>}, {pipeline_mode = #tpu.pipeline_mode<synchronous>, transform_indices = @transform_4, window_bounds = array<i64: 1, 128>}, {transform_indices = @transform_5, window_bounds = array<i64: 128, 128>}, {transform_indices = @transform_6, window_bounds = array<i64: 128, 128>}]} {
    %c0_i32 = arith.constant 0 : i32
    %0 = arith.cmpi eq, %arg1, %c0_i32 : i32
    %1 = arith.extui %0 : i1 to i32
    %c0_i32_0 = arith.constant 0 : i32
    %2 = arith.cmpi ne, %1, %c0_i32_0 : i32
    scf.if %2 {
      %cst = arith.constant -1.000000e+30 : f32
      %13 = vector.broadcast %cst : f32 to vector<128x1xf32>
      %c0 = arith.constant 0 : index
      %c0_5 = arith.constant 0 : index
      %14 = vector.load %arg10[%c0, %c0_5] : memref<128x1xf32, #tpu.memory_space<vmem>>, vector<128x1xf32>
      tpu.vector_store %arg10[%c0, %c0_5], %13 {strides = array<i32>} : memref<128x1xf32, #tpu.memory_space<vmem>>, vector<128x1xf32>,
      %cst_6 = arith.constant 0.000000e+00 : f32
      %15 = vector.broadcast %cst_6 : f32 to vector<128x1xf32>
      %c0_7 = arith.constant 0 : index
      %c0_8 = arith.constant 0 : index
      %16 = vector.load %arg11[%c0_7, %c0_8] : memref<128x1xf32, #tpu.memory_space<vmem>>, vector<128x1xf32>
      tpu.vector_store %arg11[%c0_7, %c0_8], %15 {strides = array<i32>} : memref<128x1xf32, #tpu.memory_space<vmem>>, vector<128x1xf32>,
      %cst_9 = arith.constant 0.000000e+00 : f32
      %17 = vector.broadcast %cst_9 : f32 to vector<128x128xf32>
      %c0_10 = arith.constant 0 : index
      %c0_11 = arith.constant 0 : index
      %18 = vector.load %arg12[%c0_10, %c0_11] : memref<128x128xf32, #tpu.memory_space<vmem>>, vector<128x128xf32>
      tpu.vector_store %arg12[%c0_10, %c0_11], %17 {strides = array<i32>} : memref<128x128xf32, #tpu.memory_space<vmem>>, vector<128x128xf32>,
    } else {
    }
    %c1_i32 = arith.constant 1 : i32
    %3 = arith.muli %arg0, %c1_i32 : i32
    %4 = arith.addi %3, %arg1 : i32
    %5 = arith.index_cast %4 : i32 to index
    %6 = memref.load %arg2[%5] : memref<1xi32, #tpu.memory_space<smem>>
    %c0_i32_1 = arith.constant 0 : i32
    %7 = arith.cmpi ne, %6, %c0_i32_1 : i32
    %8 = arith.extui %7 : i1 to i32
    %c0_i32_2 = arith.constant 0 : i32
    %9 = arith.cmpi ne, %8, %c0_i32_2 : i32
    scf.if %9 {
      %c0 = arith.constant 0 : index
      %c0_5 = arith.constant 0 : index
      %13 = vector.load %arg3[%c0, %c0_5] : memref<128x1xf32, #tpu.memory_space<vmem>>, vector<128x1xf32>
      %c0_6 = arith.constant 0 : index
      %c0_7 = arith.constant 0 : index
      %14 = vector.load %arg4[%c0_6, %c0_7] : memref<1x128xf32, #tpu.memory_space<vmem>>, vector<1x128xf32>
      %15 = vector.broadcast %13 : vector<128x1xf32> to vector<128x128xf32>
      %16 = vector.broadcast %14 : vector<1x128xf32> to vector<128x128xf32>
      %17 = arith.addf %15, %16 : vector<128x128xf32>
      %cst = arith.constant 2.000000e-01 : f32
      %18 = vector.broadcast %cst : f32 to vector<128x128xf32>
      %19 = arith.mulf %18, %17 : vector<128x128xf32>
      %20 = arith.maximumf %17, %19 : vector<128x128xf32>
      %c0_8 = arith.constant 0 : index
      %c0_9 = arith.constant 0 : index
      %21 = vector.load %arg8[%c0_8, %c0_9] : memref<128x128xi8, #tpu.memory_space<vmem>>, vector<128x128xi8>
      %c0_i8 = arith.constant 0 : i8
      %22 = vector.broadcast %c0_i8 : i8 to vector<128x128xi8>
      %23 = arith.cmpi ne, %21, %22 : vector<128x128xi8>
      %cst_10 = arith.constant -1.000000e+30 : f32
      %24 = vector.broadcast %cst_10 : f32 to vector<128x128xf32>
      %25 = arith.select %23, %20, %24 : vector<128x128xi1>, vector<128x128xf32>
      %c0_11 = arith.constant 0 : index
      %c0_12 = arith.constant 0 : index
      %26 = vector.load %arg10[%c0_11, %c0_12] : memref<128x1xf32, #tpu.memory_space<vmem>>, vector<128x1xf32>
      %cst_13 = arith.constant dense<0xFF800000> : vector<128xf32>
      %27 = vector.multi_reduction <maximumf>, %25, %cst_13 [1] : vector<128x128xf32> to vector<128xf32>
      %28 = vector.shape_cast %27 : vector<128xf32> to vector<128x1xf32>
      %29 = arith.maximumf %26, %28 : vector<128x1xf32>
      %30 = arith.subf %26, %29 : vector<128x1xf32>
      %31 = math.exp %30 : vector<128x1xf32>
      %32 = vector.broadcast %29 : vector<128x1xf32> to vector<128x128xf32>
      %33 = arith.subf %25, %32 : vector<128x128xf32>
      %34 = math.exp %33 : vector<128x128xf32>
      %c0_14 = arith.constant 0 : index
      %c0_15 = arith.constant 0 : index
      %35 = vector.load %arg11[%c0_14, %c0_15] : memref<128x1xf32, #tpu.memory_space<vmem>>, vector<128x1xf32>
      %36 = arith.mulf %31, %35 : vector<128x1xf32>
      %cst_16 = arith.constant dense<0.000000e+00> : vector<128xf32>
      %37 = vector.multi_reduction <add>, %34, %cst_16 [1] : vector<128x128xf32> to vector<128xf32>
      %38 = vector.shape_cast %37 : vector<128xf32> to vector<128x1xf32>
      %39 = arith.addf %36, %38 : vector<128x1xf32>
      %c0_17 = arith.constant 0 : index
      %c0_18 = arith.constant 0 : index
      %40 = vector.load %arg11[%c0_17, %c0_18] : memref<128x1xf32, #tpu.memory_space<vmem>>, vector<128x1xf32>
      tpu.vector_store %arg11[%c0_17, %c0_18], %39 {strides = array<i32>} : memref<128x1xf32, #tpu.memory_space<vmem>>, vector<128x1xf32>,
      %c0_19 = arith.constant 0 : index
      %c0_20 = arith.constant 0 : index
      %41 = vector.load %arg12[%c0_19, %c0_20] : memref<128x128xf32, #tpu.memory_space<vmem>>, vector<128x128xf32>
      %42 = vector.broadcast %31 : vector<128x1xf32> to vector<128x128xf32>
      %43 = arith.mulf %42, %41 : vector<128x128xf32>
      %44 = arith.truncf %34 : vector<128x128xf32> to vector<128x128xbf16>
      %c0_21 = arith.constant 0 : index
      %c0_22 = arith.constant 0 : index
      %45 = vector.load %arg5[%c0_21, %c0_22] : memref<128x128xbf16, #tpu.memory_space<vmem>>, vector<128x128xbf16>
      %cst_23 = arith.constant dense<0.000000e+00> : vector<128x128xf32>
      %46 = tpu.matmul %44, %45, %cst_23 {dimension_numbers = #tpu.dot_dimension_numbers<[1], [0], [0], [1], [0, 0, 1, 1], [], []>} : vector<128x128xbf16>, vector<128x128xbf16>, vector<128x128xf32> -> vector<128x128xf32>
      %47 = arith.addf %43, %46 : vector<128x128xf32>
      %c0_24 = arith.constant 0 : index
      %c0_25 = arith.constant 0 : index
      %48 = vector.load %arg12[%c0_24, %c0_25] : memref<128x128xf32, #tpu.memory_space<vmem>>, vector<128x128xf32>
      tpu.vector_store %arg12[%c0_24, %c0_25], %47 {strides = array<i32>} : memref<128x128xf32, #tpu.memory_space<vmem>>, vector<128x128xf32>,
      %c0_26 = arith.constant 0 : index
      %c0_27 = arith.constant 0 : index
      %49 = vector.load %arg10[%c0_26, %c0_27] : memref<128x1xf32, #tpu.memory_space<vmem>>, vector<128x1xf32>
      tpu.vector_store %arg10[%c0_26, %c0_27], %29 {strides = array<i32>} : memref<128x1xf32, #tpu.memory_space<vmem>>, vector<128x1xf32>,
    } else {
    }
    %c0_i32_3 = arith.constant 0 : i32
    %10 = arith.cmpi eq, %arg1, %c0_i32_3 : i32
    %11 = arith.extui %10 : i1 to i32
    %c0_i32_4 = arith.constant 0 : i32
    %12 = arith.cmpi ne, %11, %c0_i32_4 : i32
    scf.if %12 {
      %c0 = arith.constant 0 : index
      %c0_5 = arith.constant 0 : index
      %13 = vector.load %arg11[%c0, %c0_5] : memref<128x1xf32, #tpu.memory_space<vmem>>, vector<128x1xf32>
      %cst = arith.constant 9.99999968E-21 : f32
      %14 = vector.broadcast %cst : f32 to vector<128x1xf32>
      %15 = arith.maximumf %13, %14 : vector<128x1xf32>
      %16 = tpu.reciprocal %15 {approx = true} : vector<128x1xf32> -> vector<128x1xf32>
      %c0_6 = arith.constant 0 : index
      %c0_7 = arith.constant 0 : index
      %17 = vector.load %arg12[%c0_6, %c0_7] : memref<128x128xf32, #tpu.memory_space<vmem>>, vector<128x128xf32>
      %18 = vector.broadcast %16 : vector<128x1xf32> to vector<128x128xf32>
      %19 = arith.mulf %17, %18 : vector<128x128xf32>
      %c0_8 = arith.constant 0 : index
      %c0_9 = arith.constant 0 : index
      %20 = vector.load %arg6[%c0_8, %c0_9] : memref<1x128xf32, #tpu.memory_space<vmem>>, vector<1x128xf32>
      %21 = vector.broadcast %20 : vector<1x128xf32> to vector<128x128xf32>
      %22 = arith.addf %19, %21 : vector<128x128xf32>
      %cst_10 = arith.constant 0.000000e+00 : f32
      %23 = vector.broadcast %cst_10 : f32 to vector<128x128xf32>
      %24 = arith.cmpf oge, %22, %23 : vector<128x128xf32>
      %c0_11 = arith.constant 0 : index
      %c0_12 = arith.constant 0 : index
      %25 = vector.load %arg7[%c0_11, %c0_12] : memref<1x128xf32, #tpu.memory_space<vmem>>, vector<1x128xf32>
      %26 = vector.broadcast %25 : vector<1x128xf32> to vector<128x128xf32>
      %27 = arith.mulf %26, %22 : vector<128x128xf32>
      %28 = arith.select %24, %22, %27 : vector<128x128xi1>, vector<128x128xf32>
      %c0_13 = arith.constant 0 : index
      %c0_14 = arith.constant 0 : index
      %29 = vector.load %arg9[%c0_13, %c0_14] : memref<128x128xf32, #tpu.memory_space<vmem>>, vector<128x128xf32>
      tpu.vector_store %arg9[%c0_13, %c0_14], %28 {strides = array<i32>} : memref<128x128xf32, #tpu.memory_space<vmem>>, vector<128x128xf32>,
    } else {
    }
    return
  }
  func.func @transform_0(%arg0: i32, %arg1: i32, %arg2: memref<1xi32, #tpu.memory_space<smem>>) -> (i32, i32) {
    %c0_i32 = arith.constant 0 : i32
    %c0_i32_0 = arith.constant 0 : i32
    return %arg0, %c0_i32 : i32, i32
  }
  func.func @transform_1(%arg0: i32, %arg1: i32, %arg2: memref<1xi32, #tpu.memory_space<smem>>) -> (i32, i32) {
    %c0_i32 = arith.constant 0 : i32
    %c0_i32_0 = arith.constant 0 : i32
    return %c0_i32, %arg1 : i32, i32
  }
  func.func @transform_2(%arg0: i32, %arg1: i32, %arg2: memref<1xi32, #tpu.memory_space<smem>>) -> (i32, i32) {
    %c0_i32 = arith.constant 0 : i32
    %c0_i32_0 = arith.constant 0 : i32
    return %arg1, %c0_i32 : i32, i32
  }
  func.func @transform_3(%arg0: i32, %arg1: i32, %arg2: memref<1xi32, #tpu.memory_space<smem>>) -> (i32, i32) {
    %c0_i32 = arith.constant 0 : i32
    %c0_i32_0 = arith.constant 0 : i32
    %c0_i32_1 = arith.constant 0 : i32
    return %c0_i32, %c0_i32_0 : i32, i32
  }
  func.func @transform_4(%arg0: i32, %arg1: i32, %arg2: memref<1xi32, #tpu.memory_space<smem>>) -> (i32, i32) {
    %c0_i32 = arith.constant 0 : i32
    %c0_i32_0 = arith.constant 0 : i32
    %c0_i32_1 = arith.constant 0 : i32
    return %c0_i32, %c0_i32_0 : i32, i32
  }
  func.func @transform_5(%arg0: i32, %arg1: i32, %arg2: memref<1xi32, #tpu.memory_space<smem>>) -> (i32, i32) {
    %c0_i32 = arith.constant 0 : i32
    return %arg0, %arg1 : i32, i32
  }
  func.func @transform_6(%arg0: i32, %arg1: i32, %arg2: memref<1xi32, #tpu.memory_space<smem>>) -> (i32, i32) {
    %c0_i32 = arith.constant 0 : i32
    %c0_i32_0 = arith.constant 0 : i32
    return %arg0, %c0_i32 : i32, i32
  }
}

</mosaic_0001>

<bundles_post_ra>
// kernel: tpu_custom_call.1
= control target key start
LH: loop header
LB: loop body
LE: loop exit
PB: predicated region body
PF: predicated region fallthrough
CT: control target
= control target key end

     0   :  { %13 = vsyncpa [#allocation8], 0  ;;  %vm32_vm0 = vcmask 7168   ;;  %v1465_v0 = vmov -1e+30   ;;  %v1466_v1 = vmov 0.0   ;;  %s2088_s0 = inlined_call_operand.<no memory space> [shape: s32[1], index: 0, kind: input, shape index: {}]   ;;  %s2089_s1 = inlined_call_operand.vmem [shape: f32[128,1], index: 1, kind: input, shape index: {}]   ;;  %s2090_s2 = inlined_call_operand.vmem [shape: f32[1,128], index: 2, kind: input, shape index: {}]   ;;  %s2091_s3 = inlined_call_operand.vmem [shape: bf16[128,128], index: 3, kind: input, shape index: {}]   ;;  %s2092_s4 = inlined_call_operand.vmem [shape: f32[1,128], index: 4, kind: input, shape index: {}]   ;;  %s2093_s5 = inlined_call_operand.vmem [shape: f32[1,128], index: 5, kind: input, shape index: {}]   ;;  %s2094_s6 = inlined_call_operand.vmem [shape: s8[128,128], index: 6, kind: input, shape index: {}]   ;;  %s2095_s7 = inlined_call_operand.hbm [shape: f32[128,128], index: 7, kind: output, shape index: {}]  }
   0x1   :  { %33 = vst.msk [vmem:[#allocation2] sm:$0xff] %vm32_vm0, %v1465_v0  ;;  %p1262_p0 = scmp.eq.s32.totalorder %s2088_s0, 0 }
   0x2   :  { %34 = vst.msk [vmem:[#allocation2 + $0x8] sm:$0xff] %vm32_vm0, %v1465_v0 }
   0x3   :  { %35 = vst.msk [vmem:[#allocation2 + $0x10] sm:$0xff] %vm32_vm0, %v1465_v0 }
   0x4   :  { %36 = vst.msk [vmem:[#allocation2 + $0x18] sm:$0xff] %vm32_vm0, %v1465_v0 }
   0x5   :  { %37 = vst.msk [vmem:[#allocation2 + $0x20] sm:$0xff] %vm32_vm0, %v1465_v0 }
   0x6   :  { %38 = vst.msk [vmem:[#allocation2 + $0x28] sm:$0xff] %vm32_vm0, %v1465_v0 }
   0x7   :  { %39 = vst.msk [vmem:[#allocation2 + $0x30] sm:$0xff] %vm32_vm0, %v1465_v0 }
   0x8   :  { %40 = vst.msk [vmem:[#allocation2 + $0x38] sm:$0xff] %vm32_vm0, %v1465_v0 }
   0x9   :  { %41 = vst.msk [vmem:[#allocation2 + $0x40] sm:$0xff] %vm32_vm0, %v1465_v0 }
   0xa   :  { %42 = vst.msk [vmem:[#allocation2 + $0x48] sm:$0xff] %vm32_vm0, %v1465_v0 }
   0xb   :  { %43 = vst.msk [vmem:[#allocation2 + $0x50] sm:$0xff] %vm32_vm0, %v1465_v0 }
   0xc   :  { %44 = vst.msk [vmem:[#allocation2 + $0x58] sm:$0xff] %vm32_vm0, %v1465_v0 }
   0xd   :  { %45 = vst.msk [vmem:[#allocation2 + $0x60] sm:$0xff] %vm32_vm0, %v1465_v0 }
   0xe   :  { %46 = vst.msk [vmem:[#allocation2 + $0x68] sm:$0xff] %vm32_vm0, %v1465_v0 }
   0xf   :  { %47 = vst.msk [vmem:[#allocation2 + $0x70] sm:$0xff] %vm32_vm0, %v1465_v0 }
  0x10   :  { %48 = vst.msk [vmem:[#allocation2 + $0x78] sm:$0xff] %vm32_vm0, %v1465_v0 }
  0x11   :  { %49 = vst.msk [vmem:[#allocation3] sm:$0xff] %vm32_vm0, %v1466_v1 }
  0x12   :  { %50 = vst.msk [vmem:[#allocation3 + $0x8] sm:$0xff] %vm32_vm0, %v1466_v1 }
  0x13   :  { %51 = vst.msk [vmem:[#allocation3 + $0x10] sm:$0xff] %vm32_vm0, %v1466_v1 }
  0x14   :  { %52 = vst.msk [vmem:[#allocation3 + $0x18] sm:$0xff] %vm32_vm0, %v1466_v1 }
  0x15   :  { %53 = vst.msk [vmem:[#allocation3 + $0x20] sm:$0xff] %vm32_vm0, %v1466_v1 }
  0x16   :  { %54 = vst.msk [vmem:[#allocation3 + $0x28] sm:$0xff] %vm32_vm0, %v1466_v1 }
  0x17   :  { %55 = vst.msk [vmem:[#allocation3 + $0x30] sm:$0xff] %vm32_vm0, %v1466_v1 }
  0x18   :  { %56 = vst.msk [vmem:[#allocation3 + $0x38] sm:$0xff] %vm32_vm0, %v1466_v1 }
  0x19   :  { %57 = vst.msk [vmem:[#allocation3 + $0x40] sm:$0xff] %vm32_vm0, %v1466_v1 }
  0x1a   :  { %58 = vst.msk [vmem:[#allocation3 + $0x48] sm:$0xff] %vm32_vm0, %v1466_v1 }
  0x1b   :  { %59 = vst.msk [vmem:[#allocation3 + $0x50] sm:$0xff] %vm32_vm0, %v1466_v1 }
  0x1c   :  { %60 = vst.msk [vmem:[#allocation3 + $0x58] sm:$0xff] %vm32_vm0, %v1466_v1 }
  0x1d   :  { %61 = vst.msk [vmem:[#allocation3 + $0x60] sm:$0xff] %vm32_vm0, %v1466_v1 }
  0x1e   :  { %62 = vst.msk [vmem:[#allocation3 + $0x68] sm:$0xff] %vm32_vm0, %v1466_v1 }
  0x1f   :  { %63 = vst.msk [vmem:[#allocation3 + $0x70] sm:$0xff] %vm32_vm0, %v1466_v1 }
  0x20   :  { %64 = vst.msk [vmem:[#allocation3 + $0x78] sm:$0xff] %vm32_vm0, %v1466_v1 }
  0x21   :  { %65 = vst [vmem:[#allocation4 + $0x30] sm:$0xff] %v1466_v1 }
  0x22   :  { %66 = vst [vmem:[#allocation4] sm:$0xff] %v1466_v1 }
  0x23   :  { %67 = vst [vmem:[#allocation4 + $0x58] sm:$0xff] %v1466_v1 }
  0x24   :  { %68 = vst [vmem:[#allocation4 + $0x18] sm:$0xff] %v1466_v1 }
  0x25   :  { %69 = vst [vmem:[#allocation4 + $0x50] sm:$0xff] %v1466_v1 }
  0x26   :  { %70 = vst [vmem:[#allocation4 + $0x68] sm:$0xff] %v1466_v1 }
  0x27   :  { %71 = vst [vmem:[#allocation4 + $0x8] sm:$0xff] %v1466_v1 }
  0x28   :  { %72 = vst [vmem:[#allocation4 + $0x48] sm:$0xff] %v1466_v1 }
  0x29   :  { %73 = vst [vmem:[#allocation4 + $0x40] sm:$0xff] %v1466_v1 }
  0x2a   :  { %74 = vst [vmem:[#allocation4 + $0x20] sm:$0xff] %v1466_v1 }
  0x2b   :  { %75 = vst [vmem:[#allocation4 + $0x10] sm:$0xff] %v1466_v1 }
  0x2c   :  { %76 = vst [vmem:[#allocation4 + $0x38] sm:$0xff] %v1466_v1  ;;  %86 = sbr.rel (%p1262_p0) target bundleno = 612 (0x264), region = 33 }
  0x2d   :  { %77 = vst [vmem:[#allocation4 + $0x60] sm:$0xff] %v1466_v1 }
  0x2e   :  { %78 = vst [vmem:[#allocation4 + $0x70] sm:$0xff] %v1466_v1 }
  0x2f   :  { %79 = vst [vmem:[#allocation4 + $0x78] sm:$0xff] %v1466_v1 }
  0x30   :  { %80 = vst [vmem:[#allocation4 + $0x28] sm:$0xff] %v1466_v1 }
  0x31   :  { %v89_v2 = vld [vmem:[%s2089_s1 + $0x10] sm:$0xff]  ;;  %v87_v3 = vld [vmem:[%s2089_s1] sm:$0xff]  ;;  %v1467_v4 = vmov 0   ;;  %v90_v6 = vld [vmem:[%s2089_s1 + $0x18] sm:$0xff] }
  0x32   :  { %1335 = vset.pattern.permute.xlu1 %v1467_v4  ;;  %1334 = vset.pattern.permute.xlu0 %v1467_v4  ;;  %v91_v5 = vld [vmem:[%s2089_s1 + $0x20] sm:$0xff]  ;;  %v88_v7 = vld [vmem:[%s2089_s1 + $0x8] sm:$0xff]  ;;  %v94_v9 = vld [vmem:[%s2089_s1 + $0x38] sm:$0xff] }
  0x33   :  { %116 = vperm.xlu1 %1335, %v89_v2   ;;  %106 = vperm.xlu0 %1334, %v87_v3   ;;  %v92_v8 = vld [vmem:[%s2089_s1 + $0x28] sm:$0xff]  ;;  %v93_v10 = vld [vmem:[%s2089_s1 + $0x30] sm:$0xff]  ;;  %v95_v11 = vld [vmem:[%s2089_s1 + $0x40] sm:$0xff] }
  0x34   :  { %1336 = vset.pattern.permute.xlu2 %v1467_v4  ;;  %v97_v12 = vld [vmem:[%s2089_s1 + $0x50] sm:$0xff]  ;;  %v96_v13 = vld [vmem:[%s2089_s1 + $0x48] sm:$0xff]  ;;  %v98_v14 = vld [vmem:[%s2089_s1 + $0x58] sm:$0xff] }
  0x35   :  { %126 = vperm.xlu2 %1336, %v91_v5   ;;  %v100_v15 = vld [vmem:[%s2089_s1 + $0x68] sm:$0xff]  ;;  %v99_v16 = vld [vmem:[%s2089_s1 + $0x60] sm:$0xff]  ;;  %v101_v17 = vld [vmem:[%s2089_s1 + $0x70] sm:$0xff] }
  0x36   :  { %v102_v18 = vld [vmem:[%s2089_s1 + $0x78] sm:$0xff]  ;;  %v235_v19 = vld [vmem:[%s2094_s6] sm:$0xff]  ;;  %v236_v21 = vld [vmem:[%s2094_s6 + $0x8] sm:$0xff] }
  0x37   :  { %vm239_vm1 = vnez %v235_v19  ;;  %vm240_vm2 = vnez %v236_v21  ;;  %v1614_v38 = vld [vmem:[%s2090_s2] ss:$0 sm:$0xff]  ;;  %v237_v42 = vld [vmem:[%s2094_s6 + $0x10] sm:$0xff]  ;;  %v238_v1 = vld [vmem:[%s2094_s6 + $0x18] sm:$0xff] }
  0x38   :  { %v243_v20 = vsel %vm239_vm1, 16843009, %v1467_v4  ;;  %v1606_v24 = vsel %vm240_vm2, 16843009, %v1467_v4  ;;  %vm241_vm7 = vnez %v237_v42  ;;  %vm242_vm11 = vnez %v238_v1 }
  0x39   :  { %v249_v22 = vunpack.c.2.s8 %v243_v20  ;;  %v247_v23 = vunpack.c.0.s8 %v243_v20  ;;  %v251_v27 = vunpack.c.0.s8 %v1606_v24  ;;  %v248_v30 = vunpack.c.1.s8 %v243_v20 }
  0x3a   :  { %v250_v32 = vunpack.c.3.s8 %v243_v20  ;;  %v254_v40 = vunpack.c.3.s8 %v1606_v24  ;;  %v253_v41 = vunpack.c.2.s8 %v1606_v24  ;;  %v1631_v60 = vsel %vm241_vm7, 16843009, %v1467_v4 }
  0x3b   :  { %121 = vperm.xlu1 %1335, %v90_v6   ;;  %111 = vperm.xlu0 %1334, %v88_v7   ;;  %v267_v25 = vpack.c.b16 %v249_v22, %v249_v22  ;;  %v263_v26 = vpack.c.b16 %v247_v23, %v247_v23  ;;  %v271_v31 = vpack.c.b16 %v251_v27, %v251_v27  ;;  %v252_v0 = vunpack.c.1.s8 %v1606_v24 }
  0x3c   :  { %v265_v33 = vpack.c.b16 %v248_v30, %v248_v30  ;;  %v269_v37 = vpack.c.b16 %v250_v32, %v250_v32  ;;  %v277_v53 = vpack.c.b16 %v254_v40, %v254_v40  ;;  %v275_v54 = vpack.c.b16 %v253_v41, %v253_v41 }
  0x3d   :  { %131 = vperm.xlu2 %1336, %v92_v8   ;;  %v268_v28 = vpack.c.b8 %v267_v25, %v267_v25  ;;  %v264_v29 = vpack.c.b8 %v263_v26, %v263_v26  ;;  %v272_v34 = vpack.c.b8 %v271_v31, %v271_v31  ;;  %v257_v5 = vunpack.c.2.s8 %v1631_v60 }
  0x3e   :  { %v266_v39 = vpack.c.b8 %v265_v33, %v265_v33  ;;  %v270_v49 = vpack.c.b8 %v269_v37, %v269_v37  ;;  %v278_v2 = vpack.c.b8 %v277_v53, %v277_v53  ;;  %v276_v3 = vpack.c.b8 %v275_v54, %v275_v54 }
  0x3f   :  { %vm297_vm3 = vnez %v268_v28  ;;  %vm295_vm4 = vnez %v264_v29  ;;  %vm299_vm5 = vnez %v272_v34  ;;  %v256_v6 = vunpack.c.1.s8 %v1631_v60 }
  0x40   :  { %v313_v35 = vsel %vm297_vm3, 16843009, %v1467_v4  ;;  %v311_v36 = vsel %vm295_vm4, 16843009, %v1467_v4  ;;  %vm296_vm6 = vnez %v266_v39  ;;  %v315_v52 = vsel %vm299_vm5, 16843009, %v1467_v4 }
  0x41   :  { %v329_v44 = vunpack.c.0.s8 %v313_v35  ;;  %v327_v45 = vunpack.c.0.s8 %v311_v36  ;;  %v312_v58 = vsel %vm296_vm6, 16843009, %v1467_v4  ;;  %vm1626_vm10 = vnez %v270_v49 }
  0x42   :  { %v331_v63 = vunpack.c.0.s8 %v315_v52  ;;  %vm302_vm13 = vnez %v278_v2  ;;  %vm301_vm14 = vnez %v276_v3  ;;  %v1651_v21 = vsel %vm242_vm11, 16843009, %v1467_v4 }
  0x43   :  { %141 = vperm.xlu1 %1335, %v94_v9   ;;  %136 = vperm.xlu0 %1334, %v93_v10   ;;  %vm345_vm8 = vcmp.ne.s32.totalorder %v329_v44, 0  ;;  %vm343_vm9 = vcmp.ne.s32.totalorder %v327_v45, 0  ;;  %v255_v24 = vunpack.c.0.s8 %v1631_v60  ;;  %v318_v26 = vsel %vm302_vm13, 16843009, %v1467_v4 }
  0x44   :  { %vm347_vm12 = vcmp.ne.s32.totalorder %v331_v63, 0  ;;  %v317_v27 = vsel %vm301_vm14, 16843009, %v1467_v4  ;;  %v260_v31 = vunpack.c.1.s8 %v1651_v21  ;;  %v259_v32 = vunpack.c.0.s8 %v1651_v21 }
  0x45   :  { %146 = vperm.xlu2 %1336, %v95_v11   ;;  %v334_v37 = vunpack.c.0.s8 %v318_v26  ;;  %v333_v40 = vunpack.c.0.s8 %v317_v27  ;;  %v279_v41 = vpack.c.b16 %v255_v24, %v255_v24 }
  0x46   :  { %v289_v45 = vpack.c.b16 %v260_v31, %v260_v31 }
  0x47   :  { %vm350_vm5 = vcmp.ne.s32.totalorder %v334_v37, 0  ;;  %vm349_vm6 = vcmp.ne.s32.totalorder %v333_v40, 0  ;;  %v280_v53 = vpack.c.b8 %v279_v41, %v279_v41 }
  0x48   :  { %v290_v59 = vpack.c.b8 %v289_v45, %v289_v45 }
  0x49   :  { %vm303_vm7 = vnez %v280_v53 }
  0x4b   :  { %156 = vperm.xlu1 %1335, %v97_v12   ;;  %151 = vperm.xlu0 %1334, %v96_v13   ;;  %v328_v12 = vunpack.c.0.s8 %v312_v58 }
  0x4d   :  { %161 = vperm.xlu2 %1336, %v98_v14   ;;  %v314_v14 = vsel %vm1626_vm10, 16843009, %v1467_v4  ;;  %vm344_vm15 = vcmp.ne.s32.totalorder %v328_v12, 0 }
  0x4e   :  { %v330_v23 = vunpack.c.0.s8 %v314_v14 }
  0x50   :  { %vm1664_vm1 = vcmp.ne.s32.totalorder %v330_v23, 0 }
  0x53   :  { %171 = vperm.xlu1 %1335, %v100_v15   ;;  %166 = vperm.xlu0 %1334, %v99_v16   ;;  %v273_v15 = vpack.c.b16 %v252_v0, %v252_v0 }
  0x55   :  { %176 = vperm.xlu2 %1336, %v101_v17   ;;  %v283_v17 = vpack.c.b16 %v257_v5, %v257_v5  ;;  %v274_v28 = vpack.c.b8 %v273_v15, %v273_v15 }
  0x57   :  { %v284_v29 = vpack.c.b8 %v283_v17, %v283_v17  ;;  %vm300_vm2 = vnez %v274_v28  ;;  %v319_v17 = vsel %vm303_vm7, 16843009, %v1467_v4  ;;  %v261_v28 = vunpack.c.2.s8 %v1651_v21 }
  0x58   :  { %v316_v52 = vsel %vm300_vm2, 16843009, %v1467_v4 }
  0x59   :  { %vm305_vm3 = vnez %v284_v29  ;;  %v332_v5 = vunpack.c.0.s8 %v316_v52  ;;  %v291_v41 = vpack.c.b16 %v261_v28, %v261_v28 }
  0x5b   :  { %181 = vperm.xlu0 %1334, %v102_v18   ;;  %v281_v18 = vpack.c.b16 %v256_v6, %v256_v6  ;;  %vm348_vm11 = vcmp.ne.s32.totalorder %v332_v5, 0 }
  0x5d   :  { %v282_v30 = vpack.c.b8 %v281_v18, %v281_v18 }
  0x5f   :  { %vm304_vm4 = vnez %v282_v30 }
  0x8f   :  { %v127_v43 = vpop.permute.xlu2 %126 }
  0x90   :  { %v191_v46 = vadd.f32 %v1614_v38, %v127_v43 }
  0x92   :  { %v207_v57 = vmul.f32 0.2, %v191_v46 }
  0x94   :  { %v223_v11 = vmax.f32 %v191_v46, %v207_v57  ;;  %v287_v46 = vpack.c.b16 %v259_v32, %v259_v32  ;;  %v320_v57 = vsel %vm304_vm4, 16843009, %v1467_v4  ;;  %v335_v32 = vunpack.c.0.s8 %v319_v17  ;;  %v1747_v17 = vld [vmem:[#allocation2 + $0x8] sm:$0xff] }
  0x95   :  { %v336_v6 = vunpack.c.0.s8 %v320_v57 }
  0x96   :  { %v1653_v22 = vsel %vm347_vm12, %v223_v11, -1e+30 }
  0x97   :  { %v132_v16 = vpop.permute.xlu2 %131  ;;  %vm352_vm12 = vcmp.ne.s32.totalorder %v336_v6, 0 }
  0x98   :  { %v192_v42 = vadd.f32 %v1614_v38, %v132_v16 }
  0x9a   :  { %v208_v58 = vmul.f32 0.2, %v192_v42 }
  0x9c   :  { %v224_v16 = vmax.f32 %v192_v42, %v208_v58 }
  0x9e   :  { %v1696_v30 = vsel %vm348_vm11, %v224_v16, -1e+30  ;;  %v1745_v16 = vld [vmem:[#allocation2 + $0x20] sm:$0xff] }
  0xa5   :  { %v117_v47 = vpop.permute.xlu1 %116  ;;  %v107_v48 = vpop.permute.xlu0 %106 }
  0xa6   :  { %v189_v50 = vadd.f32 %v1614_v38, %v117_v47  ;;  %v187_v51 = vadd.f32 %v1614_v38, %v107_v48 }
  0xa8   :  { %v205_v55 = vmul.f32 0.2, %v189_v50  ;;  %v203_v56 = vmul.f32 0.2, %v187_v51 }
  0xaa   :  { %v221_v61 = vmax.f32 %v189_v50, %v205_v55  ;;  %v219_v62 = vmax.f32 %v187_v51, %v203_v56  ;;  %v258_v50 = vunpack.c.3.s8 %v1631_v60  ;;  %v147_v51 = vpop.permute.xlu2 %146  ;;  %v321_v56 = vsel %vm305_vm3, 16843009, %v1467_v4 }
  0xab   :  { %v337_v3 = vunpack.c.0.s8 %v321_v56  ;;  %v195_v12 = vadd.f32 %v1614_v38, %v147_v51 }
  0xac   :  { %v1639_v7 = vsel %vm345_vm8, %v221_v61, -1e+30  ;;  %v1641_v8 = vsel %vm343_vm9, %v219_v62, -1e+30  ;;  %v288_v61 = vpack.c.b8 %v287_v46, %v287_v46  ;;  %v262_v62 = vunpack.c.3.s8 %v1651_v21 }
  0xad   :  { %v122_v9 = vpop.permute.xlu1 %121  ;;  %395 = vmax.xlane.f32.xlu0 %v1639_v7  ;;  %391 = vmax.xlane.f32.xlu1 %v1641_v8  ;;  %v112_v10 = vpop.permute.xlu0 %111  ;;  %v285_v11 = vpack.c.b16 %v258_v50, %v258_v50  ;;  %vm308_vm8 = vnez %v290_v59  ;;  %vm353_vm10 = vcmp.ne.s32.totalorder %v337_v3, 0  ;;  %v211_v24 = vmul.f32 0.2, %v195_v12 }
  0xae   :  { %v188_v13 = vadd.f32 %v1614_v38, %v112_v10  ;;  %v190_v19 = vadd.f32 %v1614_v38, %v122_v9  ;;  %vm307_vm9 = vnez %v288_v61  ;;  %v292_v50 = vpack.c.b8 %v291_v41, %v291_v41 }
  0xaf   :  { %v323_v23 = vsel %vm307_vm9, 16843009, %v1467_v4  ;;  %v286_v26 = vpack.c.b8 %v285_v11, %v285_v11  ;;  %v227_v40 = vmax.f32 %v195_v12, %v211_v24  ;;  %v1729_v11 = vld [vmem:[#allocation2] sm:$0xff]  ;;  %v1731_v12 = vld [vmem:[#allocation2 + $0x10] sm:$0xff]  ;;  %v1761_v24 = vld [vmem:[#allocation2 + $0x38] sm:$0xff] }
  0xb0   :  { %v204_v20 = vmul.f32 0.2, %v188_v13  ;;  %v206_v33 = vmul.f32 0.2, %v190_v19  ;;  %v339_v37 = vunpack.c.0.s8 %v323_v23  ;;  %vm309_vm3 = vnez %v292_v50 }
  0xb1   :  { %vm306_vm13 = vnez %v286_v26  ;;  %v1765_v26 = vld [vmem:[#allocation2 + $0x30] sm:$0xff] }
  0xb2   :  { %v220_v25 = vmax.f32 %v188_v13, %v204_v20  ;;  %v222_v49 = vmax.f32 %v190_v19, %v206_v33  ;;  %v293_v13 = vpack.c.b16 %v262_v62, %v262_v62  ;;  %v324_v20 = vsel %vm308_vm8, 16843009, %v1467_v4 }
  0xb3   :  { %vm355_vm2 = vcmp.ne.s32.totalorder %v339_v37, 0  ;;  %v1784_v37 = vld [vmem:[#allocation2 + $0x50] sm:$0xff] }
  0xb4   :  { %v1660_v34 = vsel %vm344_vm15, %v220_v25, -1e+30  ;;  %v1680_v60 = vsel %vm1664_vm1, %v222_v49, -1e+30  ;;  %v162_v25 = vpop.permute.xlu2 %161  ;;  %v294_v27 = vpack.c.b8 %v293_v13, %v293_v13  ;;  %vm351_vm15 = vcmp.ne.s32.totalorder %v335_v32, 0 }
  0xb5   :  { %v142_v35 = vpop.permute.xlu1 %141  ;;  %399 = vmax.xlane.f32.xlu1 %v1653_v22  ;;  %393 = vmax.xlane.f32.xlu2 %v1660_v34  ;;  %v137_v36 = vpop.permute.xlu0 %136  ;;  %v198_v42 = vadd.f32 %v1614_v38, %v162_v25  ;;  %v1708_v49 = vsel %vm351_vm15, %v227_v40, -1e+30  ;;  %v1763_v25 = vld [vmem:[#allocation2 + $0x18] sm:$0xff] }
  0xb6   :  { %v194_v43 = vadd.f32 %v1614_v38, %v142_v35  ;;  %v193_v44 = vadd.f32 %v1614_v38, %v137_v36  ;;  %v340_v36 = vunpack.c.0.s8 %v324_v20  ;;  %vm310_vm14 = vnez %v294_v27 }
  0xb7   :  { %v214_v51 = vmul.f32 0.2, %v198_v42 }
  0xb8   :  { %v210_v47 = vmul.f32 0.2, %v194_v43  ;;  %v209_v48 = vmul.f32 0.2, %v193_v44  ;;  %vm356_vm1 = vcmp.ne.s32.totalorder %v340_v36, 0 }
  0xb9   :  { %v230_v62 = vmax.f32 %v198_v42, %v214_v51 }
  0xba   :  { %v226_v54 = vmax.f32 %v194_v43, %v210_v47  ;;  %v225_v55 = vmax.f32 %v193_v44, %v209_v48  ;;  %v322_v47 = vsel %vm306_vm13, 16843009, %v1467_v4  ;;  %v326_v48 = vsel %vm310_vm14, 16843009, %v1467_v4 }
  0xbb   :  { %v338_v56 = vunpack.c.0.s8 %v322_v47  ;;  %v342_v57 = vunpack.c.0.s8 %v326_v48  ;;  %v1805_v47 = vld [vmem:[#allocation2 + $0x40] sm:$0xff] }
  0xbc   :  { %v1676_v63 = vsel %vm350_vm5, %v226_v54, -1e+30  ;;  %v1682_v0 = vsel %vm349_vm6, %v225_v55, -1e+30  ;;  %v177_v54 = vpop.permute.xlu2 %176  ;;  %v1807_v48 = vld [vmem:[#allocation2 + $0x60] sm:$0xff] }
  0xbd   :  { %v157_v1 = vpop.permute.xlu1 %156  ;;  %405 = vmax.xlane.f32.xlu1 %v1676_v63  ;;  %397 = vmax.xlane.f32.xlu2 %v1680_v60  ;;  %v152_v2 = vpop.permute.xlu0 %151  ;;  %v201_v59 = vadd.f32 %v1614_v38, %v177_v54  ;;  %vm354_vm4 = vcmp.ne.s32.totalorder %v338_v56, 0  ;;  %vm358_vm5 = vcmp.ne.s32.totalorder %v342_v57, 0 }
  0xbe   :  { %v197_v9 = vadd.f32 %v1614_v38, %v157_v1  ;;  %403 = vmax.xlane.f32.xlu0 %v1682_v0  ;;  %v196_v10 = vadd.f32 %v1614_v38, %v152_v2  ;;  %v325_v2 = vsel %vm309_vm3, 16843009, %v1467_v4  ;;  %v1720_v5 = vsel %vm354_vm4, %v230_v62, -1e+30  ;;  %v1833_v62 = vld [vmem:[#allocation2 + $0x78] sm:$0xff] }
  0xbf   :  { %v217_v3 = vmul.f32 0.2, %v201_v59 }
  0xc0   :  { %v213_v14 = vmul.f32 0.2, %v197_v9  ;;  %v212_v15 = vmul.f32 0.2, %v196_v10 }
  0xc2   :  { %v229_v18 = vmax.f32 %v197_v9, %v213_v14  ;;  %v228_v19 = vmax.f32 %v196_v10, %v212_v15  ;;  %v341_v9 = vunpack.c.0.s8 %v325_v2  ;;  %v233_v10 = vmax.f32 %v201_v59, %v217_v3 }
  0xc4   :  { %v1694_v29 = vsel %vm353_vm10, %v229_v18, -1e+30  ;;  %v1698_v31 = vsel %vm352_vm12, %v228_v19, -1e+30  ;;  %vm357_vm6 = vcmp.ne.s32.totalorder %v341_v9, 0 }
  0xc5   :  { %v172_v33 = vpop.permute.xlu1 %171  ;;  %411 = vmax.xlane.f32.xlu1 %v1694_v29  ;;  %401 = vmax.xlane.f32.xlu2 %v1696_v30  ;;  %v167_v35 = vpop.permute.xlu0 %166 }
  0xc6   :  { %v200_v39 = vadd.f32 %v1614_v38, %v172_v33  ;;  %409 = vmax.xlane.f32.xlu0 %v1698_v31  ;;  %v199_v21 = vadd.f32 %v1614_v38, %v167_v35 }
  0xc8   :  { %v216_v43 = vmul.f32 0.2, %v200_v39  ;;  %v215_v44 = vmul.f32 0.2, %v199_v21 }
  0xca   :  { %v232_v45 = vmax.f32 %v200_v39, %v216_v43  ;;  %v231_v46 = vmax.f32 %v199_v21, %v215_v44  ;;  %v1786_v39 = vld [vmem:[#allocation2 + $0x28] sm:$0xff] }
  0xcb   :  { %v1788_v21 = vld [vmem:[#allocation2 + $0x48] sm:$0xff] }
  0xcc   :  { %v1710_v52 = vsel %vm356_vm1, %v232_v45, -1e+30  ;;  %v1712_v53 = vsel %vm355_vm2, %v231_v46, -1e+30  ;;  %v1803_v46 = vld [vmem:[#allocation2 + $0x68] sm:$0xff] }
  0xcd   :  { %417 = vmax.xlane.f32.xlu1 %v1710_v52  ;;  %407 = vmax.xlane.f32.xlu2 %v1708_v49  ;;  %v182_v55 = vpop.permute.xlu0 %181 }
  0xce   :  { %415 = vmax.xlane.f32.xlu0 %v1712_v53  ;;  %v202_v58 = vadd.f32 %v1614_v38, %v182_v55  ;;  %v1726_v38 = vsel %vm357_vm6, %v233_v10, -1e+30 }
  0xd0   :  { %v218_v61 = vmul.f32 0.2, %v202_v58 }
  0xd2   :  { %v234_v1 = vmax.f32 %v202_v58, %v218_v61  ;;  %v1831_v61 = vld [vmem:[#allocation2 + $0x58] sm:$0xff] }
  0xd4   :  { %v1722_v6 = vsel %vm358_vm5, %v234_v1, -1e+30 }
  0xd5   :  { %413 = vmax.xlane.f32.xlu2 %v1720_v5 }
  0xd6   :  { %421 = vmax.xlane.f32.xlu0 %v1722_v6 }
  0xdd   :  { %419 = vmax.xlane.f32.xlu2 %v1726_v38 }
 0x120   :  { %v392_v4 = vpop.xlane.xlu1 %391  ;;  %v396_v13 = vpop.xlane.xlu0 %395 }
 0x121   :  { %v1734_v14 = vmax.f32 %v1729_v11, %v392_v4  ;;  %v1737_v15 = vmax.f32 %v1731_v12, %v396_v13 }
 0x123   :  { %977 = vst.msk [vmem:[#allocation2] sm:$0xff] %vm32_vm0, %v1734_v14  ;;  %489 = vperm.xlu1 %1335, %v1734_v14   ;;  %499 = vperm.xlu0 %1334, %v1737_v15   ;;  %v441_v59 = vsub.f32 %v1731_v12, %v1737_v15  ;;  %v439_v4 = vsub.f32 %v1729_v11, %v1734_v14  ;;  %v1856_v14 = vld [vmem:[#allocation2 + $0x70] sm:$0xff] }
 0x124   :  { %979 = vst.msk [vmem:[#allocation2 + $0x10] sm:$0xff] %vm32_vm0, %v1737_v15 }
 0x125   :  { %v459_v2 = vmul.f32 1.442695, %v441_v59  ;;  %v455_v15 = vmul.f32 1.442695, %v439_v4  ;;  %v1299_v4 = vld [vmem:[%s2091_s3 + $0x20] sm:$0xff] }
 0x127   :  { %1338 = vpow2.f32 %v459_v2  ;;  %v1301_v2 = vld [vmem:[%s2091_s3 + $0x30] sm:$0xff] }
 0x128   :  { %v400_v18 = vpop.xlane.xlu1 %399  ;;  %v394_v19 = vpop.xlane.xlu2 %393  ;;  %1340 = vpow2.f32 %v455_v15 }
 0x129   :  { %v1750_v20 = vmax.f32 %v1745_v16, %v400_v18  ;;  %v1753_v23 = vmax.f32 %v1747_v17, %v394_v19 }
 0x12b   :  { %981 = vst.msk [vmem:[#allocation2 + $0x20] sm:$0xff] %vm32_vm0, %v1750_v20  ;;  %494 = vperm.xlu2 %1336, %v1753_v23   ;;  %509 = vperm.xlu0 %1334, %v1750_v20   ;;  %v440_v12 = vsub.f32 %v1747_v17, %v1753_v23  ;;  %v443_v11 = vsub.f32 %v1745_v16, %v1750_v20 }
 0x12c   :  { %978 = vst.msk [vmem:[#allocation2 + $0x8] sm:$0xff] %vm32_vm0, %v1753_v23 }
 0x12d   :  { %v457_v18 = vmul.f32 1.442695, %v440_v12  ;;  %v1861_v23 = vpop.eup %1338 }
 0x12f   :  { %1342 = vpow2.f32 %v457_v18 }
 0x130   :  { %v406_v27 = vpop.xlane.xlu1 %405  ;;  %v398_v28 = vpop.xlane.xlu2 %397 }
 0x131   :  { %v1768_v32 = vmax.f32 %v1761_v24, %v406_v27  ;;  %v1771_v33 = vmax.f32 %v1763_v25, %v398_v28  ;;  %v404_v35 = vpop.xlane.xlu0 %403  ;;  %v463_v27 = vmul.f32 1.442695, %v443_v11 }
 0x132   :  { %v1774_v36 = vmax.f32 %v1765_v26, %v404_v35 }
 0x133   :  { %984 = vst.msk [vmem:[#allocation2 + $0x38] sm:$0xff] %vm32_vm0, %v1768_v32  ;;  %504 = vperm.xlu1 %1335, %v1771_v33   ;;  %524 = vperm.xlu0 %1334, %v1768_v32   ;;  %v442_v28 = vsub.f32 %v1763_v25, %v1771_v33  ;;  %1344 = vpow2.f32 %v463_v27  ;;  %v446_v20 = vsub.f32 %v1761_v24, %v1768_v32  ;;  %v1302_v24 = vld [vmem:[%s2091_s3 + $0x38] sm:$0xff]  ;;  %v1295_v27 = vld [vmem:[%s2091_s3] sm:$0xff] }
 0x134   :  { %980 = vst.msk [vmem:[#allocation2 + $0x18] sm:$0xff] %vm32_vm0, %v1771_v33  ;;  %896 = vmatpush.bf16.msra.mxu0 %v1302_v24  ;;  %1303 = vmatpush.bf16.msra.mxu1 %v1302_v24 }
 0x135   :  { %983 = vst.msk [vmem:[#allocation2 + $0x30] sm:$0xff] %vm32_vm0, %v1774_v36  ;;  %v461_v25 = vmul.f32 1.442695, %v442_v28  ;;  %1304 = vmatpush.bf16.msra.mxu2 %v1302_v24  ;;  %1305 = vmatpush.bf16.msra.mxu3 %v1302_v24 }
 0x137   :  { %1346 = vpow2.f32 %v461_v25 }
 0x138   :  { %v412_v40 = vpop.xlane.xlu1 %411  ;;  %v402_v41 = vpop.xlane.xlu2 %401  ;;  %897 = vmatpush.bf16.msra.mxu0 %v1301_v2  ;;  %1306 = vmatpush.bf16.msra.mxu1 %v1301_v2 }
 0x139   :  { %v1791_v42 = vmax.f32 %v1784_v37, %v412_v40  ;;  %v428_v43 = vmax.f32 %v1786_v39, %v402_v41  ;;  %v410_v44 = vpop.xlane.xlu0 %409  ;;  %v1875_v40 = vpop.eup %1340  ;;  %v469_v41 = vmul.f32 1.442695, %v446_v20  ;;  %1307 = vmatpush.bf16.msra.mxu2 %v1301_v2  ;;  %1308 = vmatpush.bf16.msra.mxu3 %v1301_v2 }
 0x13a   :  { %v1795_v45 = vmax.f32 %v1788_v21, %v410_v44  ;;  %v1877_v44 = vpop.eup %1342 }
 0x13b   :  { %987 = vst.msk [vmem:[#allocation2 + $0x50] sm:$0xff] %vm32_vm0, %v1791_v42  ;;  %514 = vperm.xlu2 %1336, %v428_v43   ;;  %519 = vperm.xlu1 %1335, %v1774_v36   ;;  %v444_v16 = vsub.f32 %v1786_v39, %v428_v43  ;;  %v449_v39 = vsub.f32 %v1784_v37, %v1791_v42 }
 0x13c   :  { %982 = vst.msk [vmem:[#allocation2 + $0x28] sm:$0xff] %vm32_vm0, %v428_v43 }
 0x13d   :  { %986 = vst.msk [vmem:[#allocation2 + $0x48] sm:$0xff] %vm32_vm0, %v1795_v45  ;;  %v465_v33 = vmul.f32 1.442695, %v444_v16 }
 0x13f   :  { %1348 = vpow2.f32 %v465_v33 }
 0x140   :  { %v418_v50 = vpop.xlane.xlu1 %417  ;;  %v408_v51 = vpop.xlane.xlu2 %407  ;;  %1350 = vpow2.f32 %v469_v41 }
 0x141   :  { %v1810_v54 = vmax.f32 %v1803_v46, %v418_v50  ;;  %v1813_v55 = vmax.f32 %v1805_v47, %v408_v51  ;;  %v416_v56 = vpop.xlane.xlu0 %415  ;;  %v1879_v50 = vpop.eup %1344  ;;  %v445_v51 = vsub.f32 %v1765_v26, %v1774_v36 }
 0x142   :  { %v1816_v57 = vmax.f32 %v1807_v48, %v416_v56  ;;  %v1893_v43 = vpop.eup %1346  ;;  %v475_v56 = vmul.f32 1.442695, %v449_v39 }
 0x143   :  { %v452_v58 = vsub.f32 %v1803_v46, %v1810_v54  ;;  %990 = vst.msk [vmem:[#allocation2 + $0x68] sm:$0xff] %vm32_vm0, %v1810_v54  ;;  %529 = vperm.xlu2 %1336, %v1813_v55   ;;  %534 = vperm.xlu1 %1335, %v1795_v45   ;;  %v447_v32 = vsub.f32 %v1805_v47, %v1813_v55  ;;  %v467_v26 = vmul.f32 1.442695, %v445_v51 }
 0x144   :  { %985 = vst.msk [vmem:[#allocation2 + $0x40] sm:$0xff] %vm32_vm0, %v1813_v55  ;;  %549 = vperm.xlu0 %1334, %v1816_v57   ;;  %v448_v47 = vsub.f32 %v1788_v21, %v1795_v45  ;;  %v1300_v45 = vld [vmem:[%s2091_s3 + $0x28] sm:$0xff] }
 0x145   :  { %989 = vst.msk [vmem:[#allocation2 + $0x60] sm:$0xff] %vm32_vm0, %v1816_v57  ;;  %v471_v36 = vmul.f32 1.442695, %v447_v32  ;;  %v1895_v59 = vpop.eup %1348  ;;  %1352 = vpow2.f32 %v467_v26  ;;  %898 = vmatpush.bf16.msra.mxu0 %v1300_v45  ;;  %1309 = vmatpush.bf16.msra.mxu1 %v1300_v45 }
 0x146   :  { %1310 = vmatpush.bf16.msra.mxu2 %v1300_v45  ;;  %1311 = vmatpush.bf16.msra.mxu3 %v1300_v45 }
 0x147   :  { %1354 = vpow2.f32 %v471_v36 }
 0x148   :  { %v414_v1 = vpop.xlane.xlu2 %413  ;;  %1356 = vpow2.f32 %v475_v56 }
 0x149   :  { %v1836_v3 = vmax.f32 %v1831_v61, %v414_v1  ;;  %v422_v9 = vpop.xlane.xlu0 %421  ;;  %v1897_v1 = vpop.eup %1350  ;;  %899 = vmatpush.bf16.msra.mxu0 %v1299_v4  ;;  %1312 = vmatpush.bf16.msra.mxu1 %v1299_v4 }
 0x14a   :  { %v1839_v10 = vmax.f32 %v1833_v62, %v422_v9  ;;  %1313 = vmatpush.bf16.msra.mxu2 %v1299_v4  ;;  %1314 = vmatpush.bf16.msra.mxu3 %v1299_v4 }
 0x14b   :  { %988 = vst.msk [vmem:[#allocation2 + $0x58] sm:$0xff] %vm32_vm0, %v1836_v3  ;;  %554 = vperm.xlu2 %1336, %v1810_v54   ;;  %539 = vperm.xlu1 %1335, %v1791_v42   ;;  %v450_v37 = vsub.f32 %v1831_v61, %v1836_v3  ;;  %v473_v42 = vmul.f32 1.442695, %v448_v47  ;;  %v1909_v9 = vpop.eup %1352 }
 0x14c   :  { %v454_v13 = vsub.f32 %v1833_v62, %v1839_v10  ;;  %992 = vst.msk [vmem:[#allocation2 + $0x78] sm:$0xff] %vm32_vm0, %v1839_v10  ;;  %544 = vperm.xlu0 %1334, %v1836_v3   ;;  %v451_v3 = vsub.f32 %v1807_v48, %v1816_v57  ;;  %v1298_v48 = vld [vmem:[%s2091_s3 + $0x18] sm:$0xff]  ;;  %v1297_v57 = vld [vmem:[%s2091_s3 + $0x10] sm:$0xff] }
 0x14d   :  { %v477_v55 = vmul.f32 1.442695, %v450_v37  ;;  %v1911_v21 = vpop.eup %1354  ;;  %1358 = vpow2.f32 %v473_v42  ;;  %900 = vmatpush.bf16.msra.mxu0 %v1298_v48  ;;  %1315 = vmatpush.bf16.msra.mxu1 %v1298_v48 }
 0x14e   :  { %v1916_v61 = vpop.eup %1356  ;;  %v479_v12 = vmul.f32 1.442695, %v451_v3  ;;  %1316 = vmatpush.bf16.msra.mxu2 %v1298_v48  ;;  %1317 = vmatpush.bf16.msra.mxu3 %v1298_v48 }
 0x14f   :  { %1360 = vpow2.f32 %v477_v55 }
 0x150   :  { %v420_v19 = vpop.xlane.xlu2 %419  ;;  %1362 = vpow2.f32 %v479_v12 }
 0x151   :  { %v1859_v17 = vmax.f32 %v1856_v14, %v420_v19  ;;  %901 = vmatpush.bf16.msra.mxu0 %v1297_v57  ;;  %1318 = vmatpush.bf16.msra.mxu1 %v1297_v57  ;;  %v1296_v19 = vld [vmem:[%s2091_s3 + $0x8] sm:$0xff] }
 0x152   :  { %1319 = vmatpush.bf16.msra.mxu2 %v1297_v57  ;;  %1320 = vmatpush.bf16.msra.mxu3 %v1297_v57 }
 0x153   :  { %v453_v35 = vsub.f32 %v1856_v14, %v1859_v17  ;;  %991 = vst.msk [vmem:[#allocation2 + $0x70] sm:$0xff] %vm32_vm0, %v1859_v17  ;;  %559 = vperm.xlu2 %1336, %v1859_v17   ;;  %564 = vperm.xlu1 %1335, %v1839_v10   ;;  %v1926_v11 = vpop.eup %1358 }
 0x154   :  { %740 = vperm.xlu0 %1334, %v1861_v23  }
 0x155   :  { %v1928_v15 = vpop.eup %1360  ;;  %902 = vmatpush.bf16.msra.mxu0 %v1296_v19  ;;  %1321 = vmatpush.bf16.msra.mxu1 %v1296_v19 }
 0x156   :  { %v1938_v18 = vpop.eup %1362  ;;  %1322 = vmatpush.bf16.msra.mxu2 %v1296_v19  ;;  %1323 = vmatpush.bf16.msra.mxu3 %v1296_v19 }
 0x159   :  { %903 = vmatpush.bf16.msra.mxu0 %v1295_v27  ;;  %1324 = vmatpush.bf16.msra.mxu1 %v1295_v27 }
 0x15a   :  { %1325 = vmatpush.bf16.msra.mxu2 %v1295_v27  ;;  %1326 = vmatpush.bf16.msra.mxu3 %v1295_v27 }
 0x15b   :  { %730 = vperm.xlu2 %1336, %v1875_v40   ;;  %735 = vperm.xlu1 %1335, %v1877_v44  }
 0x15c   :  { %750 = vperm.xlu0 %1334, %v1879_v50  }
 0x163   :  { %745 = vperm.xlu2 %1336, %v1893_v43   ;;  %755 = vperm.xlu1 %1335, %v1895_v59  }
 0x164   :  { %765 = vperm.xlu0 %1334, %v1897_v1  }
 0x16b   :  { %760 = vperm.xlu2 %1336, %v1909_v9   ;;  %770 = vperm.xlu1 %1335, %v1911_v21  }
 0x16c   :  { %780 = vperm.xlu0 %1334, %v1916_v61  }
 0x173   :  { %775 = vperm.xlu2 %1336, %v1926_v11   ;;  %785 = vperm.xlu1 %1335, %v1928_v15  }
 0x17b   :  { %790 = vperm.xlu2 %1336, %v1938_v18  }
 0x185   :  { %v495_v28 = vpop.permute.xlu2 %494 }
 0x186   :  { %v568_v16 = vsub.f32 %v1660_v34, %v495_v28 }
 0x188   :  { %v585_v20 = vmul.f32 1.442695, %v568_v16 }
 0x18a   :  { %1364 = vpow2.f32 %v585_v20 }
 0x190   :  { %v1365_v47 = vpop.eup %1364 }
 0x195   :  { %v490_v25 = vpop.permute.xlu1 %489  ;;  %v500_v41 = vpop.permute.xlu0 %499 }
 0x196   :  { %v567_v33 = vsub.f32 %v1641_v8, %v490_v25  ;;  %v515_v51 = vpop.permute.xlu2 %514  ;;  %v569_v24 = vsub.f32 %v1639_v7, %v500_v41 }
 0x197   :  { %v572_v26 = vsub.f32 %v1696_v30, %v515_v51 }
 0x198   :  { %v583_v32 = vmul.f32 1.442695, %v567_v33  ;;  %v587_v39 = vmul.f32 1.442695, %v569_v24 }
 0x199   :  { %v593_v36 = vmul.f32 1.442695, %v572_v26 }
 0x19a   :  { %1366 = vpow2.f32 %v583_v32 }
 0x19b   :  { %1368 = vpow2.f32 %v587_v39 }
 0x19c   :  { %1370 = vpow2.f32 %v593_v36 }
 0x19d   :  { %v510_v56 = vpop.permute.xlu0 %509 }
 0x19e   :  { %v571_v34 = vsub.f32 %v1653_v22, %v510_v56  ;;  %v530_v42 = vpop.permute.xlu2 %529 }
 0x19f   :  { %v575_v7 = vsub.f32 %v1708_v49, %v530_v42 }
 0x1a0   :  { %v1367_v37 = vpop.eup %1366  ;;  %v591_v55 = vmul.f32 1.442695, %v571_v34 }
 0x1a1   :  { %647 = vadd.xlane.f32.xlu0 %v1367_v37  ;;  %v824_v8 = vpack.c.bf16 %v1365_v47, %v1367_v37  ;;  %v1369_v2 = vpop.eup %1368  ;;  %v599_v12 = vmul.f32 1.442695, %v575_v7 }
 0x1a2   :  { %1372 = vpow2.f32 %v591_v55  ;;  %651 = vadd.xlane.f32.xlu1 %v1369_v2  ;;  %v1371_v22 = vpop.eup %1370 }
 0x1a3   :  { %904 = vmatmul.bf16.vlgmr.msra.gmra.mxu0 %v824_v8 }
 0x1a4   :  { %649 = vadd.xlane.f32.xlu2 %v1365_v47 }
 0x1a5   :  { %v505_v30 = vpop.permute.xlu1 %504  ;;  %v525_v3 = vpop.permute.xlu0 %524 }
 0x1a6   :  { %v570_v45 = vsub.f32 %v1680_v60, %v505_v30  ;;  %v574_v4 = vsub.f32 %v1676_v63, %v525_v3  ;;  %v555_v28 = vpop.permute.xlu2 %554 }
 0x1a7   :  { %v580_v63 = vsub.f32 %v1710_v52, %v555_v28  ;;  %v483_v28 = vmul.f32 1.442695, %v453_v35 }
 0x1a8   :  { %v589_v48 = vmul.f32 1.442695, %v570_v45  ;;  %v1373_v57 = vpop.eup %1372  ;;  %v597_v19 = vmul.f32 1.442695, %v574_v4 }
 0x1a9   :  { %v826_v27 = vpack.c.bf16 %v1371_v22, %v1373_v57  ;;  %v609_v51 = vmul.f32 1.442695, %v580_v63 }
 0x1aa   :  { %1374 = vpow2.f32 %v589_v48  ;;  %657 = vadd.xlane.f32.xlu1 %v1371_v22 }
 0x1ab   :  { %1376 = vpow2.f32 %v599_v12  ;;  %914 = vmatmul.bf16.vlgmr.msra.gmra.mxu1 %v826_v27 }
 0x1ac   :  { %655 = vadd.xlane.f32.xlu2 %v1373_v57  ;;  %1378 = vpow2.f32 %v597_v19 }
 0x1ad   :  { %v520_v49 = vpop.permute.xlu1 %519 }
 0x1ae   :  { %v573_v16 = vsub.f32 %v1682_v0, %v520_v49  ;;  %v560_v34 = vpop.permute.xlu2 %559  ;;  %v485_v49 = vmul.f32 1.442695, %v454_v13 }
 0x1af   :  { %v581_v7 = vsub.f32 %v1726_v38, %v560_v34 }
 0x1b0   :  { %v1375_v60 = vpop.eup %1374  ;;  %v595_v20 = vmul.f32 1.442695, %v573_v16 }
 0x1b1   :  { %653 = vadd.xlane.f32.xlu0 %v1375_v60  ;;  %v825_v25 = vpack.c.bf16 %v1375_v60, %v1369_v2  ;;  %v1377_v33 = vpop.eup %1376  ;;  %v611_v4 = vmul.f32 1.442695, %v581_v7 }
 0x1b2   :  { %v1379_v41 = vpop.eup %1378  ;;  %1380 = vpow2.f32 %v595_v20  ;;  %663 = vadd.xlane.f32.xlu1 %v1377_v33 }
 0x1b3   :  { %909 = vmatmul.bf16.gmra.mxu0 %v825_v25  ;;  %1382 = vpow2.f32 %v609_v51  ;;  %v615_v51 = vld [vmem:[#allocation3] sm:$0xff] }
 0x1b4   :  { %661 = vadd.xlane.f32.xlu2 %v1379_v41 }
 0x1b5   :  { %v535_v24 = vpop.permute.xlu1 %534 }
 0x1b6   :  { %v576_v32 = vsub.f32 %v1698_v31, %v535_v24  ;;  %v550_v39 = vpop.permute.xlu0 %549  ;;  %v731_v60 = vpop.permute.xlu2 %730  ;;  %v617_v24 = vld [vmem:[#allocation3 + $0x10] sm:$0xff] }
 0x1b7   :  { %v579_v26 = vsub.f32 %v1712_v53, %v550_v39  ;;  %v616_v39 = vld [vmem:[#allocation3 + $0x8] sm:$0xff] }
 0x1b8   :  { %v601_v0 = vmul.f32 1.442695, %v576_v32  ;;  %v1381_v36 = vpop.eup %1380  ;;  %v631_v32 = vmul.f32 %v1875_v40, %v615_v51  ;;  %v712_v40 = vld [vmem:[#allocation4 + $0x30] sm:$0xff] }
 0x1b9   :  { %v607_v56 = vmul.f32 1.442695, %v579_v26  ;;  %659 = vadd.xlane.f32.xlu0 %v1381_v36  ;;  %v827_v52 = vpack.c.bf16 %v1379_v41, %v1381_v36  ;;  %v1383_v55 = vpop.eup %1382 }
 0x1ba   :  { %1384 = vpow2.f32 %v601_v0  ;;  %v633_v0 = vmul.f32 %v1861_v23, %v617_v24  ;;  %v621_v24 = vld [vmem:[#allocation3 + $0x30] sm:$0xff] }
 0x1bb   :  { %1386 = vpow2.f32 %v607_v56  ;;  %919 = vmatmul.bf16.gmra.mxu1 %v827_v52  ;;  %v632_v52 = vmul.f32 %v1877_v44, %v616_v39 }
 0x1bd   :  { %v540_v47 = vpop.permute.xlu1 %539 }
 0x1be   :  { %v577_v37 = vsub.f32 %v1694_v29, %v540_v47  ;;  %v545_v42 = vpop.permute.xlu0 %544  ;;  %v1983_v62 = vpop.permute.xlu2 %745 }
 0x1bf   :  { %v578_v31 = vsub.f32 %v1720_v5, %v545_v42  ;;  %v620_v42 = vld [vmem:[#allocation3 + $0x28] sm:$0xff] }
 0x1c0   :  { %v1385_v8 = vpop.eup %1384  ;;  %v603_v2 = vmul.f32 1.442695, %v577_v37 }
 0x1c1   :  { %v1387_v53 = vpop.eup %1386  ;;  %v605_v30 = vmul.f32 1.442695, %v578_v31  ;;  %v828_v45 = vpack.c.bf16 %v1385_v8, %v1377_v33  ;;  %665 = vadd.xlane.f32.xlu0 %v1385_v8  ;;  %v636_v31 = vmul.f32 %v1895_v59, %v620_v42  ;;  %v713_v59 = vld [vmem:[#allocation4] sm:$0xff] }
 0x1c2   :  { %1388 = vpow2.f32 %v603_v2  ;;  %v830_v3 = vpack.c.bf16 %v1383_v55, %v1387_v53  ;;  %v808_v2 = vmul.f32 %v731_v60, %v712_v40 }
 0x1c3   :  { %1390 = vpow2.f32 %v605_v30  ;;  %924 = vmatmul.bf16.vlgmr.msra.gmra.mxu2 %v828_v45  ;;  %v618_v45 = vld [vmem:[#allocation3 + $0x18] sm:$0xff] }
 0x1c4   :  { %934 = vmatmul.bf16.vlgmr.msra.gmra.mxu3 %v830_v3  ;;  %1392 = vpow2.f32 %v611_v4  ;;  %v623_v4 = vld [vmem:[#allocation3 + $0x40] sm:$0xff] }
 0x1c5   :  { %v565_v22 = vpop.permute.xlu1 %564 }
 0x1c6   :  { %v582_v29 = vsub.f32 %v1722_v6, %v565_v22  ;;  %v481_v6 = vmul.f32 1.442695, %v452_v58  ;;  %v1981_v54 = vpop.permute.xlu0 %740  ;;  %v1987_v14 = vpop.permute.xlu2 %760  ;;  %v634_v22 = vmul.f32 %v1893_v43, %v618_v45 }
 0x1c8   :  { %v1389_v12 = vpop.eup %1388  ;;  %v613_v48 = vmul.f32 1.442695, %v582_v29  ;;  %v622_v29 = vld [vmem:[#allocation3 + $0x38] sm:$0xff] }
 0x1c9   :  { %v1391_v5 = vpop.eup %1390  ;;  %667 = vadd.xlane.f32.xlu2 %v1389_v12  ;;  %671 = vadd.xlane.f32.xlu0 %v1387_v53 }
 0x1ca   :  { %1394 = vpow2.f32 %v613_v48  ;;  %669 = vadd.xlane.f32.xlu1 %v1391_v5  ;;  %v1393_v38 = vpop.eup %1392  ;;  %v829_v19 = vpack.c.bf16 %v1391_v5, %v1389_v12  ;;  %v716_v48 = vld [vmem:[#allocation4 + $0x50] sm:$0xff] }
 0x1cb   :  { %1396 = vpow2.f32 %v481_v6 }
 0x1cc   :  { %1398 = vpow2.f32 %v485_v49 }
 0x1cd   :  { %1400 = vpow2.f32 %v483_v28  ;;  %v736_v58 = vpop.permute.xlu1 %735 }
 0x1ce   :  { %v751_v10 = vpop.permute.xlu0 %750  ;;  %v1993_v63 = vpop.permute.xlu2 %775 }
 0x1cf   :  { %v812_v49 = vmul.f32 %v751_v10, %v716_v48  ;;  %v628_v48 = vld [vmem:[#allocation3 + $0x68] sm:$0xff] }
 0x1d0   :  { %v1395_v57 = vpop.eup %1394 }
 0x1d1   :  { %673 = vadd.xlane.f32.xlu2 %v1383_v55  ;;  %v831_v27 = vpack.c.bf16 %v1395_v57, %v1393_v38  ;;  %677 = vadd.xlane.f32.xlu0 %v1395_v57  ;;  %v1972_v16 = vpop.eup %1396  ;;  %v619_v55 = vld [vmem:[#allocation3 + $0x20] sm:$0xff]  ;;  %v638_v57 = vmul.f32 %v1897_v1, %v622_v29  ;;  %v637_v1 = vmul.f32 %v1909_v9, %v621_v24  ;;  %v718_v9 = vld [vmem:[#allocation4 + $0x8] sm:$0xff] }
 0x1d2   :  { %675 = vadd.xlane.f32.xlu1 %v1393_v38  ;;  %v1975_v20 = vpop.eup %1398  ;;  %v635_v23 = vmul.f32 %v1879_v50, %v619_v55  ;;  %v639_v50 = vmul.f32 %v1911_v21, %v623_v4 }
 0x1d3   :  { %929 = vmatmul.bf16.gmra.mxu2 %v829_v19  ;;  %v1978_v46 = vpop.eup %1400  ;;  %v809_v19 = vmul.f32 %v736_v58, %v713_v59  ;;  %v717_v58 = vld [vmem:[#allocation4 + $0x68] sm:$0xff] }
 0x1d4   :  { %939 = vmatmul.bf16.gmra.mxu3 %v831_v27 }
 0x1d5   :  { %v1985_v13 = vpop.permute.xlu1 %755 }
 0x1d6   :  { %v1989_v17 = vpop.permute.xlu0 %765  ;;  %v1999_v41 = vpop.permute.xlu2 %790 }
 0x1dd   :  { %v1991_v35 = vpop.permute.xlu1 %770 }
 0x1de   :  { %v1995_v25 = vpop.permute.xlu0 %780 }
 0x1e5   :  { %795 = vperm.xlu0 %1334, %v1972_v16   ;;  %v1997_v33 = vpop.permute.xlu1 %785 }
 0x1e9   :  { %805 = vperm.xlu2 %1336, %v1975_v20  }
 0x1eb   :  { %800 = vperm.xlu1 %1335, %v1978_v46  }
 0x214   :  { %v648_v26 = vpop.xlane.xlu0 %647 }
 0x215   :  { %v679_v36 = vadd.f32 %v648_v26, %v631_v32  ;;  %v652_v56 = vpop.xlane.xlu1 %651  ;;  %v714_v32 = vld [vmem:[#allocation4 + $0x58] sm:$0xff] }
 0x216   :  { %v681_v47 = vadd.f32 %v652_v56, %v633_v0  ;;  %v810_v10 = vmul.f32 %v1981_v54, %v714_v32  ;;  %v813_v0 = vmul.f32 %v1985_v13, %v717_v58  ;;  %v814_v54 = vmul.f32 %v1987_v14, %v718_v9 }
 0x217   :  { %696 = vst.msk [vmem:[#allocation3] sm:$0xff] %vm32_vm0, %v679_v36  ;;  %v650_v34 = vpop.xlane.xlu2 %649 }
 0x218   :  { %v680_v37 = vadd.f32 %v650_v34, %v632_v52  ;;  %698 = vst.msk [vmem:[#allocation3 + $0x10] sm:$0xff] %vm32_vm0, %v681_v47  ;;  %v624_v47 = vld [vmem:[#allocation3 + $0x48] sm:$0xff] }
 0x219   :  { %v640_v42 = vmul.f32 %v1926_v11, %v624_v47 }
 0x21a   :  { %697 = vst.msk [vmem:[#allocation3 + $0x8] sm:$0xff] %vm32_vm0, %v680_v37  ;;  %v715_v37 = vld [vmem:[#allocation4 + $0x18] sm:$0xff] }
 0x21d   :  { %v658_v8 = vpop.xlane.xlu1 %657 }
 0x21e   :  { %v684_v53 = vadd.f32 %v658_v8, %v636_v31  ;;  %v811_v31 = vmul.f32 %v1983_v62, %v715_v37  ;;  %v625_v8 = vld [vmem:[#allocation3 + $0x50] sm:$0xff]  ;;  %v727_v37 = vld [vmem:[#allocation4 + $0x28] sm:$0xff] }
 0x21f   :  { %v656_v44 = vpop.xlane.xlu2 %655 }
 0x220   :  { %v683_v7 = vadd.f32 %v656_v44, %v635_v23  ;;  %v905_v30 = vpop.f32.mrf.mxu0  ;;  %701 = vst.msk [vmem:[#allocation3 + $0x28] sm:$0xff] %vm32_vm0, %v684_v53  ;;  %v626_v53 = vld [vmem:[#allocation3 + $0x58] sm:$0xff]  ;;  %v627_v44 = vld [vmem:[#allocation3 + $0x60] sm:$0xff] }
 0x221   :  { %v945_v3 = vadd.f32 %v905_v30, %v808_v2  ;;  %v641_v30 = vmul.f32 %v1916_v61, %v625_v8  ;;  %v642_v45 = vmul.f32 %v1928_v15, %v626_v53  ;;  %v643_v62 = vmul.f32 %v1938_v18, %v627_v44  ;;  %v630_v15 = vld [vmem:[#allocation3 + $0x78] sm:$0xff] }
 0x222   :  { %700 = vst.msk [vmem:[#allocation3 + $0x20] sm:$0xff] %vm32_vm0, %v683_v7 }
 0x223   :  { %961 = vst [vmem:[#allocation4 + $0x30] sm:$0xff] %v945_v3  ;;  %v719_v3 = vld [vmem:[#allocation4 + $0x48] sm:$0xff] }
 0x224   :  { %v654_v12 = vpop.xlane.xlu0 %653 }
 0x225   :  { %v682_v5 = vadd.f32 %v654_v12, %v634_v22  ;;  %v664_v38 = vpop.xlane.xlu1 %663  ;;  %v815_v12 = vmul.f32 %v1989_v17, %v719_v3 }
 0x226   :  { %v687_v27 = vadd.f32 %v664_v38, %v639_v50  ;;  %v629_v50 = vld [vmem:[#allocation3 + $0x70] sm:$0xff]  ;;  %v724_v38 = vld [vmem:[#allocation4 + $0x60] sm:$0xff] }
 0x227   :  { %699 = vst.msk [vmem:[#allocation3 + $0x18] sm:$0xff] %vm32_vm0, %v682_v5  ;;  %v662_v6 = vpop.xlane.xlu2 %661  ;;  %v720_v5 = vld [vmem:[#allocation4 + $0x40] sm:$0xff] }
 0x228   :  { %v686_v28 = vadd.f32 %v662_v6, %v638_v57  ;;  %v907_v60 = vpop.f32.mrf.mxu0  ;;  %704 = vst.msk [vmem:[#allocation3 + $0x40] sm:$0xff] %vm32_vm0, %v687_v27  ;;  %v915_v51 = vpop.f32.mrf.mxu1  ;;  %v644_v57 = vmul.f32 %v1972_v16, %v628_v48  ;;  %v645_v27 = vmul.f32 %v1978_v46, %v629_v50  ;;  %v646_v6 = vmul.f32 %v1975_v20, %v630_v15  ;;  %v721_v20 = vld [vmem:[#allocation4 + $0x20] sm:$0xff] }
 0x229   :  { %v946_v43 = vadd.f32 %v907_v60, %v809_v19  ;;  %v949_v21 = vadd.f32 %v915_v51, %v812_v49  ;;  %v816_v17 = vmul.f32 %v1991_v35, %v720_v5  ;;  %v817_v46 = vmul.f32 %v1993_v63, %v721_v20 }
 0x22a   :  { %703 = vst.msk [vmem:[#allocation3 + $0x38] sm:$0xff] %vm32_vm0, %v686_v28 }
 0x22b   :  { %962 = vst [vmem:[#allocation4] sm:$0xff] %v946_v43  ;;  %v820_v43 = vmul.f32 %v1999_v41, %v724_v38 }
 0x22c   :  { %965 = vst [vmem:[#allocation4 + $0x50] sm:$0xff] %v949_v21  ;;  %v660_v39 = vpop.xlane.xlu0 %659 }
 0x22d   :  { %v685_v26 = vadd.f32 %v660_v39, %v637_v1  ;;  %v722_v39 = vld [vmem:[#allocation4 + $0x10] sm:$0xff] }
 0x22f   :  { %702 = vst.msk [vmem:[#allocation3 + $0x30] sm:$0xff] %vm32_vm0, %v685_v26  ;;  %v818_v26 = vmul.f32 %v1995_v25, %v722_v39 }
 0x230   :  { %v910_v36 = vpop.f32.mrf.mxu0  ;;  %v917_v52 = vpop.f32.mrf.mxu1 }
 0x231   :  { %v947_v56 = vadd.f32 %v910_v36, %v810_v10  ;;  %v950_v34 = vadd.f32 %v917_v52, %v813_v0  ;;  %v725_v0 = vld [vmem:[#allocation4 + $0x70] sm:$0xff] }
 0x233   :  { %963 = vst [vmem:[#allocation4 + $0x58] sm:$0xff] %v947_v56 }
 0x234   :  { %966 = vst [vmem:[#allocation4 + $0x68] sm:$0xff] %v950_v34  ;;  %v666_v55 = vpop.xlane.xlu0 %665  ;;  %v723_v34 = vld [vmem:[#allocation4 + $0x38] sm:$0xff] }
 0x235   :  { %v688_v40 = vadd.f32 %v666_v55, %v640_v42  ;;  %v726_v55 = vld [vmem:[#allocation4 + $0x78] sm:$0xff]  ;;  %v819_v63 = vmul.f32 %v1997_v33, %v723_v34 }
 0x237   :  { %705 = vst.msk [vmem:[#allocation3 + $0x48] sm:$0xff] %vm32_vm0, %v688_v40 }
 0x238   :  { %v912_v13 = vpop.f32.mrf.mxu0  ;;  %v920_v2 = vpop.f32.mrf.mxu1 }
 0x239   :  { %v948_v23 = vadd.f32 %v912_v13, %v811_v31  ;;  %v951_v7 = vadd.f32 %v920_v2, %v814_v54 }
 0x23b   :  { %964 = vst [vmem:[#allocation4 + $0x18] sm:$0xff] %v948_v23 }
 0x23c   :  { %967 = vst [vmem:[#allocation4 + $0x8] sm:$0xff] %v951_v7  ;;  %v668_v11 = vpop.xlane.xlu2 %667  ;;  %v672_v22 = vpop.xlane.xlu0 %671 }
 0x23d   :  { %v689_v14 = vadd.f32 %v668_v11, %v641_v30  ;;  %v670_v4 = vpop.xlane.xlu1 %669  ;;  %v691_v59 = vadd.f32 %v672_v22, %v643_v62 }
 0x23e   :  { %v690_v29 = vadd.f32 %v670_v4, %v642_v45 }
 0x23f   :  { %706 = vst.msk [vmem:[#allocation3 + $0x50] sm:$0xff] %vm32_vm0, %v689_v14 }
 0x240   :  { %707 = vst.msk [vmem:[#allocation3 + $0x58] sm:$0xff] %vm32_vm0, %v690_v29  ;;  %v922_v61 = vpop.f32.mrf.mxu1 }
 0x241   :  { %708 = vst.msk [vmem:[#allocation3 + $0x60] sm:$0xff] %vm32_vm0, %v691_v59  ;;  %v952_v18 = vadd.f32 %v922_v61, %v815_v12 }
 0x243   :  { %968 = vst [vmem:[#allocation4 + $0x48] sm:$0xff] %v952_v18 }
 0x244   :  { %v674_v19 = vpop.xlane.xlu2 %673  ;;  %v678_v60 = vpop.xlane.xlu0 %677 }
 0x245   :  { %v692_v49 = vadd.f32 %v674_v19, %v644_v57  ;;  %v676_v28 = vpop.xlane.xlu1 %675  ;;  %v694_v24 = vadd.f32 %v678_v60, %v646_v6 }
 0x246   :  { %v693_v51 = vadd.f32 %v676_v28, %v645_v27  ;;  %v925_v21 = vpop.f32.mrf.mxu2 }
 0x247   :  { %709 = vst.msk [vmem:[#allocation3 + $0x68] sm:$0xff] %vm32_vm0, %v692_v49  ;;  %v953_v32 = vadd.f32 %v925_v21, %v816_v17  ;;  %v935_v16 = vpop.f32.mrf.mxu3 }
 0x248   :  { %710 = vst.msk [vmem:[#allocation3 + $0x70] sm:$0xff] %vm32_vm0, %v693_v51  ;;  %v957_v1 = vadd.f32 %v935_v16, %v820_v43 }
 0x249   :  { %711 = vst.msk [vmem:[#allocation3 + $0x78] sm:$0xff] %vm32_vm0, %v694_v24 }
 0x24a   :  { %969 = vst [vmem:[#allocation4 + $0x40] sm:$0xff] %v953_v32 }
 0x24b   :  { %973 = vst [vmem:[#allocation4 + $0x60] sm:$0xff] %v957_v1 }
 0x24c   :  { %v806_v42 = vpop.permute.xlu2 %805 }
 0x24d   :  { %v823_v31 = vmul.f32 %v806_v42, %v727_v37 }
 0x24e   :  { %v927_v35 = vpop.f32.mrf.mxu2 }
 0x24f   :  { %v954_v58 = vadd.f32 %v927_v35, %v817_v46  ;;  %v937_v41 = vpop.f32.mrf.mxu3 }
 0x251   :  { %970 = vst [vmem:[#allocation4 + $0x20] sm:$0xff] %v954_v58 }
 0x256   :  { %v930_v10 = vpop.f32.mrf.mxu2 }
 0x257   :  { %v955_v36 = vadd.f32 %v930_v10, %v818_v26  ;;  %v940_v56 = vpop.f32.mrf.mxu3  ;;  %v796_v52 = vpop.permute.xlu0 %795 }
 0x258   :  { %v821_v47 = vmul.f32 %v796_v52, %v725_v0 }
 0x259   :  { %971 = vst [vmem:[#allocation4 + $0x10] sm:$0xff] %v955_v36 }
 0x25a   :  { %v958_v9 = vadd.f32 %v937_v41, %v821_v47 }
 0x25c   :  { %974 = vst [vmem:[#allocation4 + $0x70] sm:$0xff] %v958_v9 }
 0x25d   :  { %v801_v40 = vpop.permute.xlu1 %800 }
 0x25e   :  { %v822_v54 = vmul.f32 %v801_v40, %v726_v55  ;;  %v932_v13 = vpop.f32.mrf.mxu2 }
 0x25f   :  { %v956_v25 = vadd.f32 %v932_v13, %v819_v63  ;;  %v942_v8 = vpop.f32.mrf.mxu3 }
 0x260   :  { %v959_v23 = vadd.f32 %v940_v56, %v822_v54  ;;  %v960_v2 = vadd.f32 %v942_v8, %v823_v31 }
 0x261   :  { %972 = vst [vmem:[#allocation4 + $0x38] sm:$0xff] %v956_v25 }
 0x262   :  { %975 = vst [vmem:[#allocation4 + $0x78] sm:$0xff] %v959_v23 }
 0x263   :  { %976 = vst [vmem:[#allocation4 + $0x28] sm:$0xff] %v960_v2 }
 0x264 PF:  { %v1000_v53 = vld [vmem:[#allocation3 + $0x20] sm:$0xff]  ;;  %v998_v44 = vld [vmem:[#allocation3 + $0x10] sm:$0xff]  ;;  %v1468_v30 = vmov 0   ;;  %v1001_v62 = vld [vmem:[#allocation3 + $0x28] sm:$0xff]  ;;  %s1250_s1 = sshll.u32 %s2095_s7, 4  ;;  %s1470_s14 = smov 128   ;;  %s1251_s1 = int_to_ptr.hbm [resolvable:$true] %s1250_s1 }
 0x265   :  { %v996_v7 = vld [vmem:[#allocation3] sm:$0xff]  ;;  %1404 = vset.pattern.permute.xlu2 %v1468_v30  ;;  %1403 = vset.pattern.permute.xlu1 %v1468_v30  ;;  %v1016_v33 = vmax.f32 %v1000_v53, 1e-20  ;;  %v1014_v11 = vmax.f32 %v998_v44, 1e-20  ;;  %v999_v3 = vld [vmem:[#allocation3 + $0x18] sm:$0xff] }
 0x266   :  { %v1012_v45 = vmax.f32 %v996_v7, 1e-20  ;;  %1402 = vset.pattern.permute.xlu0 %v1468_v30  ;;  %v997_v14 = vld [vmem:[#allocation3 + $0x8] sm:$0xff]  ;;  %v1017_v4 = vmax.f32 %v1001_v62, 1e-20  ;;  %v1004_v48 = vld [vmem:[#allocation3 + $0x40] sm:$0xff] }
 0x267   :  { %1407 = vrcp.f32 %v1016_v33  ;;  %v1015_v22 = vmax.f32 %v999_v3, 1e-20  ;;  %v1013_v29 = vmax.f32 %v997_v14, 1e-20  ;;  %v1003_v50 = vld [vmem:[#allocation3 + $0x38] sm:$0xff]  ;;  %v1002_v15 = vld [vmem:[#allocation3 + $0x30] sm:$0xff] }
 0x268   :  { %1409 = vrcp.f32 %v1014_v11  ;;  %v1020_v5 = vmax.f32 %v1004_v48, 1e-20  ;;  %v1019_v18 = vmax.f32 %v1003_v50, 1e-20  ;;  %v1018_v57 = vmax.f32 %v1002_v15, 1e-20 }
 0x269   :  { %1411 = vrcp.f32 %v1012_v45  ;;  %v1007_v6 = vld [vmem:[#allocation3 + $0x58] sm:$0xff]  ;;  %v1006_v17 = vld [vmem:[#allocation3 + $0x50] sm:$0xff]  ;;  %v1005_v49 = vld [vmem:[#allocation3 + $0x48] sm:$0xff]  ;;  %s1471_s15 = smov 8  }
 0x26a   :  { %1413 = vrcp.f32 %v1017_v4  ;;  %v1023_v28 = vmax.f32 %v1007_v6, 1e-20  ;;  %v1022_v60 = vmax.f32 %v1006_v17, 1e-20  ;;  %v1021_v51 = vmax.f32 %v1005_v49, 1e-20 }
 0x26b   :  { %1415 = vrcp.f32 %v1015_v22  ;;  %v1010_v32 = vld [vmem:[#allocation3 + $0x70] sm:$0xff]  ;;  %v1009_v16 = vld [vmem:[#allocation3 + $0x68] sm:$0xff]  ;;  %v1008_v1 = vld [vmem:[#allocation3 + $0x60] sm:$0xff] }
 0x26c   :  { %1417 = vrcp.f32 %v1013_v29  ;;  %v1026_v20 = vmax.f32 %v1010_v32, 1e-20  ;;  %v1025_v46 = vmax.f32 %v1009_v16, 1e-20  ;;  %v1024_v58 = vmax.f32 %v1008_v1, 1e-20 }
 0x26d   :  { %v1408_v59 = vpop.eup %1407  ;;  %1419 = vrcp.f32 %v1020_v5  ;;  %v1011_v26 = vld [vmem:[#allocation3 + $0x78] sm:$0xff]  ;;  %v1048_v47 = vld [vmem:[#allocation4 + $0x50] sm:$0xff]  ;;  %v2046_v37 = vld [vmem:[%s2092_s4] ss:$0 sm:$0xff]  ;;  %s1469_s4 = smov [#allocation7]  }
 0x26e   :  { %v1410_v12 = vpop.eup %1409  ;;  %1082 = vperm.xlu2 %1404, %v1408_v59   ;;  %1421 = vrcp.f32 %v1019_v18  ;;  %v1027_v0 = vmax.f32 %v1011_v26, 1e-20  ;;  %v2051_v9 = vld [vmem:[%s2093_s5] ss:$0 sm:$0xff]  ;;  %v1049_v40 = vld [vmem:[#allocation4 + $0x68] sm:$0xff]  ;;  %v1055_v33 = vld [vmem:[#allocation4 + $0x38] sm:$0xff] }
 0x26f   :  { %v1412_v61 = vpop.eup %1411  ;;  %1072 = vperm.xlu1 %1403, %v1410_v12   ;;  %1423 = vrcp.f32 %v1018_v57  ;;  %v1052_v23 = vld [vmem:[#allocation4 + $0x40] sm:$0xff]  ;;  %v1046_v45 = vld [vmem:[#allocation4 + $0x58] sm:$0xff]  ;;  %v1044_v3 = vld [vmem:[#allocation4 + $0x30] sm:$0xff]  ;;  %s1248_s5 = sshll.u32 %s1469_s4, 4  ;;  %s1249_s5 = int_to_ptr.vmem [resolvable:$true] %s1248_s5 }
 0x270   :  { %1062 = vperm.xlu0 %1402, %v1412_v61   ;;  %v1414_v38 = vpop.eup %1413  ;;  %1425 = vrcp.f32 %v1023_v28  ;;  %v1058_v5 = vld [vmem:[#allocation4 + $0x78] sm:$0xff]  ;;  %v1045_v6 = vld [vmem:[#allocation4] sm:$0xff] }
 0x271   :  { %v1416_v19 = vpop.eup %1415  ;;  %1427 = vrcp.f32 %v1022_v60  ;;  %v1047_v57 = vld [vmem:[#allocation4 + $0x18] sm:$0xff] }
 0x272   :  { %v1418_v27 = vpop.eup %1417  ;;  %1429 = vrcp.f32 %v1021_v51 }
 0x273   :  { %v1420_v43 = vpop.eup %1419  ;;  %1431 = vrcp.f32 %v1026_v20 }
 0x274   :  { %v1422_v24 = vpop.eup %1421  ;;  %1433 = vrcp.f32 %v1025_v46 }
 0x275   :  { %v1424_v21 = vpop.eup %1423  ;;  %1435 = vrcp.f32 %v1024_v58 }
 0x276   :  { %1087 = vperm.xlu2 %1404, %v1414_v38   ;;  %v1426_v35 = vpop.eup %1425  ;;  %1437 = vrcp.f32 %v1027_v0 }
 0x277   :  { %1077 = vperm.xlu1 %1403, %v1416_v19   ;;  %v1428_v41 = vpop.eup %1427 }
 0x278   :  { %1067 = vperm.xlu0 %1402, %v1418_v27   ;;  %v1430_v39 = vpop.eup %1429 }
 0x279   :  { %v1432_v10 = vpop.eup %1431 }
 0x27a   :  { %v1434_v36 = vpop.eup %1433 }
 0x27b   :  { %v1436_v56 = vpop.eup %1435 }
 0x27c   :  { %v1438_v52 = vpop.eup %1437 }
 0x27e   :  { %1102 = vperm.xlu2 %1404, %v1420_v43  }
 0x27f   :  { %1097 = vperm.xlu1 %1403, %v1422_v24  }
 0x280   :  { %1092 = vperm.xlu0 %1402, %v1424_v21  }
 0x286   :  { %1117 = vperm.xlu2 %1404, %v1426_v35   ;;  %v1051_v35 = vld [vmem:[#allocation4 + $0x48] sm:$0xff] }
 0x287   :  { %1112 = vperm.xlu1 %1403, %v1428_v41   ;;  %v1050_v41 = vld [vmem:[#allocation4 + $0x8] sm:$0xff] }
 0x288   :  { %1107 = vperm.xlu0 %1402, %v1430_v39  }
 0x28e   :  { %1132 = vperm.xlu2 %1404, %v1432_v10  }
 0x28f   :  { %1127 = vperm.xlu1 %1403, %v1434_v36  }
 0x290   :  { %1122 = vperm.xlu0 %1402, %v1436_v56  }
 0x298   :  { %1137 = vperm.xlu0 %1402, %v1438_v52  }
 0x2c8   :  { %v1083_v34 = vpop.permute.xlu2 %1082 }
 0x2c9   :  { %v1144_v42 = vmul.f32 %v1083_v34, %v1048_v47 }
 0x2cb   :  { %v1164_v55 = vadd.f32 %v2046_v37, %v1144_v42  ;;  %v1054_v42 = vld [vmem:[#allocation4 + $0x10] sm:$0xff] }
 0x2cd   :  { %vm1180_vm0 = vcmp.ge.f32.partialorder %v1164_v55, 0.0  ;;  %v1200_v63 = vmul.f32 %v2051_v9, %v1164_v55 }
 0x2cf   :  { %v1216_v31 = vsel %vm1180_vm0, %v1164_v55, %v1200_v63  ;;  %v1053_v63 = vld [vmem:[#allocation4 + $0x20] sm:$0xff] }
 0x2d0   :  { %1232 = vst [vmem:[#allocation7 + $0x20] sm:$0xff] %v1216_v31  ;;  %v1088_v54 = vpop.permute.xlu2 %1087 }
 0x2d1   :  { %v1145_v13 = vmul.f32 %v1088_v54, %v1049_v40 }
 0x2d3   :  { %v1165_v25 = vadd.f32 %v2046_v37, %v1145_v13 }
 0x2d5   :  { %vm1181_vm7 = vcmp.ge.f32.partialorder %v1165_v25, 0.0  ;;  %v1201_v8 = vmul.f32 %v2051_v9, %v1165_v25 }
 0x2d7   :  { %v1217_v2 = vsel %vm1181_vm7, %v1165_v25, %v1201_v8 }
 0x2d8   :  { %1233 = vst [vmem:[#allocation7 + $0x28] sm:$0xff] %v1217_v2  ;;  %v1103_v53 = vpop.permute.xlu2 %1102 }
 0x2d9   :  { %v1148_v44 = vmul.f32 %v1103_v53, %v1052_v23 }
 0x2db   :  { %v1168_v7 = vadd.f32 %v2046_v37, %v1148_v44  ;;  %v1057_v44 = vld [vmem:[#allocation4 + $0x70] sm:$0xff] }
 0x2dd   :  { %vm1184_vm8 = vcmp.ge.f32.partialorder %v1168_v7, 0.0  ;;  %v1204_v30 = vmul.f32 %v2051_v9, %v1168_v7 }
 0x2df   :  { %v1220_v11 = vsel %vm1184_vm8, %v1168_v7, %v1204_v30  ;;  %v1056_v30 = vld [vmem:[#allocation4 + $0x60] sm:$0xff] }
 0x2e0   :  { %1236 = vst [vmem:[#allocation7 + $0x40] sm:$0xff] %v1220_v11  ;;  %v1118_v62 = vpop.permute.xlu2 %1117 }
 0x2e1   :  { %v1151_v14 = vmul.f32 %v1118_v62, %v1055_v33  ;;  %v1073_v4 = vpop.permute.xlu1 %1072 }
 0x2e2   :  { %v1142_v22 = vmul.f32 %v1073_v4, %v1046_v45  ;;  %v1063_v29 = vpop.permute.xlu0 %1062 }
 0x2e3   :  { %v1171_v59 = vadd.f32 %v2046_v37, %v1151_v14  ;;  %v1140_v12 = vmul.f32 %v1063_v29, %v1044_v3 }
 0x2e4   :  { %v1162_v48 = vadd.f32 %v2046_v37, %v1142_v22 }
 0x2e5   :  { %vm1187_vm9 = vcmp.ge.f32.partialorder %v1171_v59, 0.0  ;;  %v1207_v61 = vmul.f32 %v2051_v9, %v1171_v59  ;;  %v1160_v50 = vadd.f32 %v2046_v37, %v1140_v12  ;;  %v1059_v12 = vld [vmem:[#allocation4 + $0x28] sm:$0xff] }
 0x2e6   :  { %vm1178_vm10 = vcmp.ge.f32.partialorder %v1162_v48, 0.0  ;;  %v1198_v15 = vmul.f32 %v2051_v9, %v1162_v48 }
 0x2e7   :  { %v1223_v18 = vsel %vm1187_vm9, %v1171_v59, %v1207_v61  ;;  %vm1176_vm11 = vcmp.ge.f32.partialorder %v1160_v50, 0.0  ;;  %v1196_v38 = vmul.f32 %v2051_v9, %v1160_v50 }
 0x2e8   :  { %1239 = vst [vmem:[#allocation7 + $0x58] sm:$0xff] %v1223_v18  ;;  %v1214_v19 = vsel %vm1178_vm10, %v1162_v48, %v1198_v15  ;;  %v1133_v27 = vpop.permute.xlu2 %1132 }
 0x2e9   :  { %1230 = vst [vmem:[#allocation7 + $0x10] sm:$0xff] %v1214_v19  ;;  %v1212_v17 = vsel %vm1176_vm11, %v1160_v50, %v1196_v38  ;;  %v1154_v49 = vmul.f32 %v1133_v27, %v1058_v5  ;;  %v1078_v28 = vpop.permute.xlu1 %1077 }
 0x2ea   :  { %1228 = vst [vmem:[#allocation7] sm:$0xff] %v1212_v17  ;;  %v1143_v60 = vmul.f32 %v1078_v28, %v1047_v57  ;;  %v1068_v43 = vpop.permute.xlu0 %1067 }
 0x2eb   :  { %v1174_v51 = vadd.f32 %v2046_v37, %v1154_v49  ;;  %v1141_v24 = vmul.f32 %v1068_v43, %v1045_v6 }
 0x2ec   :  { %v1163_v21 = vadd.f32 %v2046_v37, %v1143_v60 }
 0x2ed   :  { %vm1190_vm12 = vcmp.ge.f32.partialorder %v1174_v51, 0.0  ;;  %v1210_v32 = vmul.f32 %v2051_v9, %v1174_v51  ;;  %v1161_v16 = vadd.f32 %v2046_v37, %v1141_v24 }
 0x2ee   :  { %vm1179_vm13 = vcmp.ge.f32.partialorder %v1163_v21, 0.0  ;;  %v1199_v1 = vmul.f32 %v2051_v9, %v1163_v21 }
 0x2ef   :  { %v1226_v20 = vsel %vm1190_vm12, %v1174_v51, %v1210_v32  ;;  %vm1177_vm14 = vcmp.ge.f32.partialorder %v1161_v16, 0.0  ;;  %v1197_v46 = vmul.f32 %v2051_v9, %v1161_v16 }
 0x2f0   :  { %1242 = vst [vmem:[#allocation7 + $0x70] sm:$0xff] %v1226_v20  ;;  %v1215_v58 = vsel %vm1179_vm13, %v1163_v21, %v1199_v1 }
 0x2f1   :  { %1231 = vst [vmem:[#allocation7 + $0x18] sm:$0xff] %v1215_v58  ;;  %v1213_v39 = vsel %vm1177_vm14, %v1161_v16, %v1197_v46  ;;  %v1098_v26 = vpop.permute.xlu1 %1097 }
 0x2f2   :  { %1229 = vst [vmem:[#allocation7 + $0x8] sm:$0xff] %v1213_v39  ;;  %v1147_v10 = vmul.f32 %v1098_v26, %v1051_v35  ;;  %v1093_v0 = vpop.permute.xlu0 %1092 }
 0x2f3   :  { %v1146_v36 = vmul.f32 %v1093_v0, %v1050_v41 }
 0x2f4   :  { %v1167_v56 = vadd.f32 %v2046_v37, %v1147_v10 }
 0x2f5   :  { %v1166_v52 = vadd.f32 %v2046_v37, %v1146_v36 }
 0x2f6   :  { %vm1183_vm15 = vcmp.ge.f32.partialorder %v1167_v56, 0.0  ;;  %v1203_v47 = vmul.f32 %v2051_v9, %v1167_v56 }
 0x2f7   :  { %vm1182_vm1 = vcmp.ge.f32.partialorder %v1166_v52, 0.0  ;;  %v1202_v34 = vmul.f32 %v2051_v9, %v1166_v52 }
 0x2f8   :  { %v1219_v55 = vsel %vm1183_vm15, %v1167_v56, %v1203_v47 }
 0x2f9   :  { %1235 = vst [vmem:[#allocation7 + $0x38] sm:$0xff] %v1219_v55  ;;  %v1218_v40 = vsel %vm1182_vm1, %v1166_v52, %v1202_v34  ;;  %v1113_v31 = vpop.permute.xlu1 %1112 }
 0x2fa   :  { %1234 = vst [vmem:[#allocation7 + $0x30] sm:$0xff] %v1218_v40  ;;  %v1150_v54 = vmul.f32 %v1113_v31, %v1054_v42  ;;  %v1108_v13 = vpop.permute.xlu0 %1107 }
 0x2fb   :  { %v1149_v25 = vmul.f32 %v1108_v13, %v1053_v63 }
 0x2fc   :  { %v1170_v8 = vadd.f32 %v2046_v37, %v1150_v54 }
 0x2fd   :  { %v1169_v23 = vadd.f32 %v2046_v37, %v1149_v25 }
 0x2fe   :  { %vm1186_vm2 = vcmp.ge.f32.partialorder %v1170_v8, 0.0  ;;  %v1206_v2 = vmul.f32 %v2051_v9, %v1170_v8 }
 0x2ff   :  { %vm1185_vm3 = vcmp.ge.f32.partialorder %v1169_v23, 0.0  ;;  %v1205_v53 = vmul.f32 %v2051_v9, %v1169_v23 }
 0x300   :  { %v1222_v7 = vsel %vm1186_vm2, %v1170_v8, %v1206_v2 }
 0x301   :  { %1238 = vst [vmem:[#allocation7 + $0x50] sm:$0xff] %v1222_v7  ;;  %v1221_v33 = vsel %vm1185_vm3, %v1169_v23, %v1205_v53  ;;  %v1128_v11 = vpop.permute.xlu1 %1127 }
 0x302   :  { %1237 = vst [vmem:[#allocation7 + $0x48] sm:$0xff] %v1221_v33  ;;  %v1153_v45 = vmul.f32 %v1128_v11, %v1057_v44  ;;  %v1123_v62 = vpop.permute.xlu0 %1122 }
 0x303   :  { %v1152_v3 = vmul.f32 %v1123_v62, %v1056_v30 }
 0x304   :  { %v1173_v14 = vadd.f32 %v2046_v37, %v1153_v45 }
 0x305   :  { %v1172_v4 = vadd.f32 %v2046_v37, %v1152_v3 }
 0x306   :  { %vm1189_vm4 = vcmp.ge.f32.partialorder %v1173_v14, 0.0  ;;  %v1209_v22 = vmul.f32 %v2051_v9, %v1173_v14 }
 0x307   :  { %vm1188_vm5 = vcmp.ge.f32.partialorder %v1172_v4, 0.0  ;;  %v1208_v29 = vmul.f32 %v2051_v9, %v1172_v4 }
 0x308   :  { %v1225_v59 = vsel %vm1189_vm4, %v1173_v14, %v1209_v22 }
 0x309   :  { %1241 = vst [vmem:[#allocation7 + $0x68] sm:$0xff] %v1225_v59  ;;  %v1224_v48 = vsel %vm1188_vm5, %v1172_v4, %v1208_v29 }
 0x30a   :  { %1240 = vst [vmem:[#allocation7 + $0x60] sm:$0xff] %v1224_v48  ;;  %v1138_v61 = vpop.permute.xlu0 %1137 }
 0x30b   :  { %v1155_v50 = vmul.f32 %v1138_v61, %v1059_v12 }
 0x30d   :  { %v1175_v15 = vadd.f32 %v2046_v37, %v1155_v50 }
 0x30f   :  { %vm1191_vm6 = vcmp.ge.f32.partialorder %v1175_v15, 0.0  ;;  %v1211_v5 = vmul.f32 %v2051_v9, %v1175_v15 }
 0x311   :  { %v1227_v18 = vsel %vm1191_vm6, %v1175_v15, %v1211_v5 }
 0x312   :  { %1243 = vst [vmem:[#allocation7 + $0x78] sm:$0xff] %v1227_v18 }
 0x313   :  { %1256 = dma.vmem_to_hbm [thread:$0]  %s1249_s5, 2048, %s1251_s1, [#allocation8], %s1470_s14, %s1470_s14, %s1471_s15  }
 0x314   :  { %1463 = dma.done.wait [#allocation8], 2048  }
 0x315   :  { %1464 = vsyncadd [#allocation8], 4294965248 }
 0x316   :  { %1261 = vsyncpa [#allocation8], 1 }

</bundles_post_ra>
